<compile_context>
chip_gen: v7x
topology: tpu7x:2x2x1
jax: 0.10.0
libtpu: 0.0.40
codegen_flags: <defaults>
</compile_context>

<pallas_src>
import functools

import jax
import jax.numpy as jnp
from jax import lax
from jax.experimental import pallas as pl
from jax.experimental.pallas import tpu as pltpu


def _round_up(x, m):
    return (x + m - 1) // m * m


def _bottleneck_kernel(s_ref, x_ref, w1_ref, b1_ref, w2_ref, w3_ref, b3_ref,
                       o_ref, pad_ref, *, H, W, Cip, Wp, Cop):
    # s_ref: SMEM (2,) = [bias2a, bias2b]
    b2a = s_ref[0]
    b2b = s_ref[1]

    x2d = x_ref[0].reshape(H * W, Cip)                        # f32, residual

    # ---- conv1 (1x1): relu(x @ W1 + b1_vec)   [bias1a folded into b1_vec] ----
    h1 = jnp.dot(x2d.astype(jnp.bfloat16), w1_ref[...],
                 preferred_element_type=jnp.float32)
    h1 = jnp.maximum(h1 + b1_ref[...], 0.0)                   # (H*W, Wp) f32

    # ---- conv2 (3x3, pad=1, stride=1): im2col + one bf16 matmul ----
    # Zero only the 1-pixel border strips; the interior is fully rewritten
    # every grid step (no full-buffer zero, and no pl.when(pid==0) hazard
    # under megacore sharding of the parallel batch axis).
    zrow = jnp.zeros((1, W + 2, Wp), jnp.float32)
    zcol = jnp.zeros((H, 1, Wp), jnp.float32)
    pad_ref[0:1, :, :] = zrow
    pad_ref[H + 1:H + 2, :, :] = zrow
    pad_ref[1:H + 1, 0:1, :] = zcol
    pad_ref[1:H + 1, W + 1:W + 2, :] = zcol
    # bias2a added BEFORE zero padding (must not be folded into the weights).
    pad_ref[1:H + 1, 1:W + 1, :] = (h1 + b2a).reshape(H, W, Wp)

    taps = []
    for k in range(9):
        ky, kx = k // 3, k % 3
        tap = pad_ref[ky:ky + H, kx:kx + W, :].reshape(H * W, Wp)
        taps.append(tap.astype(jnp.bfloat16))
    im2col = jnp.concatenate(taps, axis=-1)                   # (H*W, 9*Wp) bf16
    h2 = jnp.dot(im2col, w2_ref[...], preferred_element_type=jnp.float32)
    h2 = jnp.maximum(h2 + b2b, 0.0)                           # (H*W, Wp) f32

    # ---- conv3 (1x1): h2 @ (scale*W3) + b3_vec  [bias3a/scale/bias3b folded] --
    h3 = jnp.dot(h2.astype(jnp.bfloat16), w3_ref[...],
                 preferred_element_type=jnp.float32)
    out = h3 + b3_ref[...] + x2d                              # identity residual
    o_ref[0] = jnp.maximum(out, 0.0).reshape(H, W, Cop)


def fixup_bottleneck_forward(x_nchw, p):
    """PyTorch-faithful forward. x_nchw: (N, C_in, H, W) f32; p: dict with
    conv1_w (width, C_in, 1, 1), conv2_w (width, width, 3, 3),
    conv3_w (C_out, width, 1, 1) and scalar params bias1a..bias3b, scale."""
    N, C_in, H, W = x_nchw.shape
    width = p["conv1_w"].shape[0]
    C_out = p["conv3_w"].shape[0]
    # Kernel supports the default identity-skip config only.
    assert C_out == C_in, "identity residual requires inplanes == planes*expansion"

    LANE = 128
    Cip = _round_up(C_in, LANE)
    Wp = _round_up(width, LANE)
    Cop = _round_up(C_out, LANE)
    assert Cip == Cop

    # ---- inputs: NCHW -> NHWC, lane-pad channels with zeros ----
    x_nhwc = jnp.transpose(x_nchw, (0, 2, 3, 1))
    x_p = jnp.pad(x_nhwc, ((0, 0), (0, 0), (0, 0), (0, Cip - C_in)))

    # ---- conv1: fold bias1a/bias1b into a per-channel bias vector ----
    w1 = p["conv1_w"][:, :, 0, 0].T                           # (C_in, width)
    b1_vec = p["bias1a"] * w1.sum(axis=0) + p["bias1b"]       # (width,)
    w1_p = jnp.zeros((Cip, Wp), jnp.float32).at[:C_in, :width].set(w1)
    w1_p = w1_p.astype(jnp.bfloat16)
    b1_p = jnp.zeros((1, Wp), jnp.float32).at[0, :width].set(b1_vec)

    # ---- conv2: (out,in,3,3) -> (9*Wp, Wp) im2col weight, tap k = ky*3+kx ----
    w2 = jnp.transpose(p["conv2_w"], (2, 3, 1, 0))            # (3,3,in,out)
    w2_p = jnp.zeros((3, 3, Wp, Wp), jnp.float32).at[:, :, :width, :width].set(w2)
    w2_p = w2_p.reshape(9 * Wp, Wp).astype(jnp.bfloat16)

    # ---- conv3: fold scale into W3, (scale*bias3a*colsum(W3)+bias3b) into bias --
    w3 = p["conv3_w"][:, :, 0, 0].T                           # (width, C_out)
    b3_vec = p["scale"] * p["bias3a"] * w3.sum(axis=0) + p["bias3b"]
    w3_p = jnp.zeros((Wp, Cop), jnp.float32).at[:width, :C_out].set(p["scale"] * w3)
    w3_p = w3_p.astype(jnp.bfloat16)
    b3_p = jnp.zeros((1, Cop), jnp.float32).at[0, :C_out].set(b3_vec)

    # bias2a / bias2b stay scalar (SMEM)
    scalars = jnp.concatenate([p["bias2a"], p["bias2b"]]).astype(jnp.float32)

    kernel = functools.partial(_bottleneck_kernel, H=H, W=W,
                               Cip=Cip, Wp=Wp, Cop=Cop)

    out_p = pl.pallas_call(
        kernel,
        out_shape=jax.ShapeDtypeStruct((N, H, W, Cop), jnp.float32),
        grid_spec=pl.GridSpec(
            grid=(N,),
            in_specs=[
                pl.BlockSpec(memory_space=pltpu.SMEM),                    # [b2a,b2b]
                pl.BlockSpec((1, H, W, Cip), lambda n: (n, 0, 0, 0)),     # x
                pl.BlockSpec((Cip, Wp), lambda n: (0, 0)),                # W1 (bf16)
                pl.BlockSpec((1, Wp), lambda n: (0, 0)),                  # b1 vec
                pl.BlockSpec((9 * Wp, Wp), lambda n: (0, 0)),             # W2 im2col
                pl.BlockSpec((Wp, Cop), lambda n: (0, 0)),                # scale*W3
                pl.BlockSpec((1, Cop), lambda n: (0, 0)),                 # b3 vec
            ],
            out_specs=pl.BlockSpec((1, H, W, Cop), lambda n: (n, 0, 0, 0)),
            scratch_shapes=[pltpu.VMEM((H + 2, W + 2, Wp), jnp.float32)],
        ),
        compiler_params=pltpu.CompilerParams(
            dimension_semantics=("parallel",)),
    )(scalars, x_p, w1_p, b1_p, w2_p, w3_p, b3_p)

    out = out_p[..., :C_out]                                   # drop lane padding
    return jnp.transpose(out, (0, 3, 1, 2))                    # back to NCHW


def _ref_forward(x, p):
    """Pure-JAX (lax.conv) reference of the PyTorch forward, NCHW, f32."""
    dn = ("NCHW", "OIHW", "NCHW")
    out = lax.conv_general_dilated(x + p["bias1a"], p["conv1_w"], (1, 1),
                                   "VALID", dimension_numbers=dn)
    out = jnp.maximum(out + p["bias1b"], 0.0)
    out = lax.conv_general_dilated(out + p["bias2a"], p["conv2_w"], (1, 1),
                                   ((1, 1), (1, 1)), dimension_numbers=dn)
    out = jnp.maximum(out + p["bias2b"], 0.0)
    out = lax.conv_general_dilated(out + p["bias3a"], p["conv3_w"], (1, 1),
                                   "VALID", dimension_numbers=dn)
    out = out * p["scale"] + p["bias3b"]
    out = out + x
    return jnp.maximum(out, 0.0)


if __name__ == "__main__":
    # Small config: inplanes = 16, planes = 4 -> width = 4, expansion*planes = 16.
    N, H, W = 2, 8, 8
    inplanes, planes = 16, 4
    width = planes              # base_width=64, groups=1
    C_out = planes * 4          # expansion = 4 (== inplanes -> identity skip)

    key = jax.random.PRNGKey(0)
    kx, k1, k2, k3, kb = jax.random.split(key, 5)

    x = jax.random.normal(kx, (N, inplanes, H, W), dtype=jnp.float32)

    params = {
        "conv1_w": jax.random.normal(k1, (width, inplanes, 1, 1), jnp.float32) * 0.1,
        "conv2_w": jax.random.normal(k2, (width, width, 3, 3), jnp.float32) * 0.1,
        "conv3_w": jax.random.normal(k3, (C_out, width, 1, 1), jnp.float32) * 0.1,
    }
    b = jax.random.normal(kb, (7,), dtype=jnp.float32) * 0.1
    params.update({
        "bias1a": b[0:1], "bias1b": b[1:2],
        "bias2a": b[2:3], "bias2b": b[3:4],
        "bias3a": b[4:5], "scale": 1.0 + b[5:6], "bias3b": b[6:7],
    })

    out = fixup_bottleneck_forward(x, params)
    out = jax.block_until_ready(out)

    ref = _ref_forward(x, params)
    assert out.shape == (N, C_out, H, W)
    max_err = float(jnp.max(jnp.abs(out - ref)))
    # bf16 matmul operands vs f32 reference -> relaxed tolerance.
    assert jnp.allclose(out, ref, rtol=3e-2, atol=3e-2), f"mismatch, max_err={max_err}"

    print("KERNEL_OK")
</pallas_src>

<mosaic_0001>
module attributes {stable_mosaic.version = 11 : i64} {
  func.func @_bottleneck_kernel(%arg0: i32, %arg1: memref<2xf32, #tpu.memory_space<smem>>, %arg2: memref<1x8x8x128xf32, #tpu.memory_space<vmem>>, %arg3: memref<128x128xbf16, #tpu.memory_space<vmem>>, %arg4: memref<1x128xf32, #tpu.memory_space<vmem>>, %arg5: memref<1152x128xbf16, #tpu.memory_space<vmem>>, %arg6: memref<128x128xbf16, #tpu.memory_space<vmem>>, %arg7: memref<1x128xf32, #tpu.memory_space<vmem>>, %arg8: memref<1x8x8x128xf32, #tpu.memory_space<vmem>>, %arg9: memref<10x10x128xf32, #tpu.memory_space<vmem>>) attributes {dimension_semantics = [#tpu.dimension_semantics<parallel>], iteration_bounds = array<i64: 2>, scalar_prefetch = 0 : i64, scratch_operands = 1 : i64, tpu.core_type = #tpu.core_type<tc>, window_params = [{transform_indices = @transform_0, window_bounds = array<i64: 2>}, {transform_indices = @transform_1, window_bounds = array<i64: 1, 8, 8, 128>}, {pipeline_mode = #tpu.pipeline_mode<synchronous>, transform_indices = @transform_2, window_bounds = array<i64: 128, 128>}, {pipeline_mode = #tpu.pipeline_mode<synchronous>, transform_indices = @transform_3, window_bounds = array<i64: 1, 128>}, {pipeline_mode = #tpu.pipeline_mode<synchronous>, transform_indices = @transform_4, window_bounds = array<i64: 1152, 128>}, {pipeline_mode = #tpu.pipeline_mode<synchronous>, transform_indices = @transform_5, window_bounds = array<i64: 128, 128>}, {pipeline_mode = #tpu.pipeline_mode<synchronous>, transform_indices = @transform_6, window_bounds = array<i64: 1, 128>}, {transform_indices = @transform_7, window_bounds = array<i64: 1, 8, 8, 128>}]} {
    %c0 = arith.constant 0 : index
    %0 = memref.load %arg1[%c0] : memref<2xf32, #tpu.memory_space<smem>>
    %c1 = arith.constant 1 : index
    %1 = memref.load %arg1[%c1] : memref<2xf32, #tpu.memory_space<smem>>
    %c0_0 = arith.constant 0 : index
    %c0_1 = arith.constant 0 : index
    %c0_2 = arith.constant 0 : index
    %c0_3 = arith.constant 0 : index
    %2 = vector.load %arg2[%c0_0, %c0_1, %c0_2, %c0_3] : memref<1x8x8x128xf32, #tpu.memory_space<vmem>>, vector<1x8x8x128xf32>
    %3 = vector.shape_cast %2 : vector<1x8x8x128xf32> to vector<8x8x128xf32>
    %4 = vector.shape_cast %3 : vector<8x8x128xf32> to vector<64x128xf32>
    %5 = arith.truncf %4 : vector<64x128xf32> to vector<64x128xbf16>
    %c0_4 = arith.constant 0 : index
    %c0_5 = arith.constant 0 : index
    %6 = vector.load %arg3[%c0_4, %c0_5] : memref<128x128xbf16, #tpu.memory_space<vmem>>, vector<128x128xbf16>
    %cst = arith.constant dense<0.000000e+00> : vector<64x128xf32>
    %7 = tpu.matmul %5, %6, %cst {dimension_numbers = #tpu.dot_dimension_numbers<[1], [0], [0], [1], [0, 0, 1, 1], [], []>} : vector<64x128xbf16>, vector<128x128xbf16>, vector<64x128xf32> -> vector<64x128xf32>
    %c0_6 = arith.constant 0 : index
    %c0_7 = arith.constant 0 : index
    %8 = vector.load %arg4[%c0_6, %c0_7] : memref<1x128xf32, #tpu.memory_space<vmem>>, vector<1x128xf32>
    %9 = vector.broadcast %8 : vector<1x128xf32> to vector<64x128xf32>
    %10 = arith.addf %7, %9 : vector<64x128xf32>
    %cst_8 = arith.constant 0.000000e+00 : f32
    %11 = vector.broadcast %cst_8 : f32 to vector<64x128xf32>
    %12 = arith.maximumf %10, %11 : vector<64x128xf32>
    %cst_9 = arith.constant 0.000000e+00 : f32
    %13 = vector.broadcast %cst_9 : f32 to vector<1x10x128xf32>
    %cst_10 = arith.constant 0.000000e+00 : f32
    %14 = vector.broadcast %cst_10 : f32 to vector<8x1x128xf32>
    %c0_11 = arith.constant 0 : index
    %c0_12 = arith.constant 0 : index
    %c0_13 = arith.constant 0 : index
    %15 = vector.load %arg9[%c0_11, %c0_12, %c0_13] : memref<10x10x128xf32, #tpu.memory_space<vmem>>, vector<1x10x128xf32>
    tpu.vector_store %arg9[%c0_11, %c0_12, %c0_13], %13 {strides = array<i32>} : memref<10x10x128xf32, #tpu.memory_space<vmem>>, vector<1x10x128xf32>,
    %c9 = arith.constant 9 : index
    %c0_14 = arith.constant 0 : index
    %c0_15 = arith.constant 0 : index
    %16 = vector.load %arg9[%c9, %c0_14, %c0_15] : memref<10x10x128xf32, #tpu.memory_space<vmem>>, vector<1x10x128xf32>
    tpu.vector_store %arg9[%c9, %c0_14, %c0_15], %13 {strides = array<i32>} : memref<10x10x128xf32, #tpu.memory_space<vmem>>, vector<1x10x128xf32>,
    %c1_16 = arith.constant 1 : index
    %c0_17 = arith.constant 0 : index
    %c0_18 = arith.constant 0 : index
    %17 = vector.load %arg9[%c1_16, %c0_17, %c0_18] : memref<10x10x128xf32, #tpu.memory_space<vmem>>, vector<8x1x128xf32>
    tpu.vector_store %arg9[%c1_16, %c0_17, %c0_18], %14 {strides = array<i32>} : memref<10x10x128xf32, #tpu.memory_space<vmem>>, vector<8x1x128xf32>,
    %c1_19 = arith.constant 1 : index
    %c9_20 = arith.constant 9 : index
    %c0_21 = arith.constant 0 : index
    %18 = vector.load %arg9[%c1_19, %c9_20, %c0_21] : memref<10x10x128xf32, #tpu.memory_space<vmem>>, vector<8x1x128xf32>
    tpu.vector_store %arg9[%c1_19, %c9_20, %c0_21], %14 {strides = array<i32>} : memref<10x10x128xf32, #tpu.memory_space<vmem>>, vector<8x1x128xf32>,
    %19 = vector.broadcast %0 : f32 to vector<64x128xf32>
    %20 = arith.addf %12, %19 : vector<64x128xf32>
    %21 = vector.shape_cast %20 : vector<64x128xf32> to vector<8x8x128xf32>
    %c1_22 = arith.constant 1 : index
    %c1_23 = arith.constant 1 : index
    %c0_24 = arith.constant 0 : index
    %22 = vector.load %arg9[%c1_22, %c1_23, %c0_24] : memref<10x10x128xf32, #tpu.memory_space<vmem>>, vector<8x8x128xf32>
    tpu.vector_store %arg9[%c1_22, %c1_23, %c0_24], %21 {strides = array<i32>} : memref<10x10x128xf32, #tpu.memory_space<vmem>>, vector<8x8x128xf32>,
    %c0_25 = arith.constant 0 : index
    %c0_26 = arith.constant 0 : index
    %c0_27 = arith.constant 0 : index
    %23 = vector.load %arg9[%c0_25, %c0_26, %c0_27] : memref<10x10x128xf32, #tpu.memory_space<vmem>>, vector<8x8x128xf32>
    %24 = vector.shape_cast %23 : vector<8x8x128xf32> to vector<64x128xf32>
    %25 = arith.truncf %24 : vector<64x128xf32> to vector<64x128xbf16>
    %c0_28 = arith.constant 0 : index
    %c1_29 = arith.constant 1 : index
    %c0_30 = arith.constant 0 : index
    %26 = vector.load %arg9[%c0_28, %c1_29, %c0_30] : memref<10x10x128xf32, #tpu.memory_space<vmem>>, vector<8x8x128xf32>
    %27 = vector.shape_cast %26 : vector<8x8x128xf32> to vector<64x128xf32>
    %28 = arith.truncf %27 : vector<64x128xf32> to vector<64x128xbf16>
    %c0_31 = arith.constant 0 : index
    %c2 = arith.constant 2 : index
    %c0_32 = arith.constant 0 : index
    %29 = vector.load %arg9[%c0_31, %c2, %c0_32] : memref<10x10x128xf32, #tpu.memory_space<vmem>>, vector<8x8x128xf32>
    %30 = vector.shape_cast %29 : vector<8x8x128xf32> to vector<64x128xf32>
    %31 = arith.truncf %30 : vector<64x128xf32> to vector<64x128xbf16>
    %c1_33 = arith.constant 1 : index
    %c0_34 = arith.constant 0 : index
    %c0_35 = arith.constant 0 : index
    %32 = vector.load %arg9[%c1_33, %c0_34, %c0_35] : memref<10x10x128xf32, #tpu.memory_space<vmem>>, vector<8x8x128xf32>
    %33 = vector.shape_cast %32 : vector<8x8x128xf32> to vector<64x128xf32>
    %34 = arith.truncf %33 : vector<64x128xf32> to vector<64x128xbf16>
    %c1_36 = arith.constant 1 : index
    %c1_37 = arith.constant 1 : index
    %c0_38 = arith.constant 0 : index
    %35 = vector.load %arg9[%c1_36, %c1_37, %c0_38] : memref<10x10x128xf32, #tpu.memory_space<vmem>>, vector<8x8x128xf32>
    %36 = vector.shape_cast %35 : vector<8x8x128xf32> to vector<64x128xf32>
    %37 = arith.truncf %36 : vector<64x128xf32> to vector<64x128xbf16>
    %c1_39 = arith.constant 1 : index
    %c2_40 = arith.constant 2 : index
    %c0_41 = arith.constant 0 : index
    %38 = vector.load %arg9[%c1_39, %c2_40, %c0_41] : memref<10x10x128xf32, #tpu.memory_space<vmem>>, vector<8x8x128xf32>
    %39 = vector.shape_cast %38 : vector<8x8x128xf32> to vector<64x128xf32>
    %40 = arith.truncf %39 : vector<64x128xf32> to vector<64x128xbf16>
    %c2_42 = arith.constant 2 : index
    %c0_43 = arith.constant 0 : index
    %c0_44 = arith.constant 0 : index
    %41 = vector.load %arg9[%c2_42, %c0_43, %c0_44] : memref<10x10x128xf32, #tpu.memory_space<vmem>>, vector<8x8x128xf32>
    %42 = vector.shape_cast %41 : vector<8x8x128xf32> to vector<64x128xf32>
    %43 = arith.truncf %42 : vector<64x128xf32> to vector<64x128xbf16>
    %c2_45 = arith.constant 2 : index
    %c1_46 = arith.constant 1 : index
    %c0_47 = arith.constant 0 : index
    %44 = vector.load %arg9[%c2_45, %c1_46, %c0_47] : memref<10x10x128xf32, #tpu.memory_space<vmem>>, vector<8x8x128xf32>
    %45 = vector.shape_cast %44 : vector<8x8x128xf32> to vector<64x128xf32>
    %46 = arith.truncf %45 : vector<64x128xf32> to vector<64x128xbf16>
    %c2_48 = arith.constant 2 : index
    %c2_49 = arith.constant 2 : index
    %c0_50 = arith.constant 0 : index
    %47 = vector.load %arg9[%c2_48, %c2_49, %c0_50] : memref<10x10x128xf32, #tpu.memory_space<vmem>>, vector<8x8x128xf32>
    %48 = vector.shape_cast %47 : vector<8x8x128xf32> to vector<64x128xf32>
    %49 = arith.truncf %48 : vector<64x128xf32> to vector<64x128xbf16>
    %50 = tpu.concatenate %25, %28, %31, %34, %37, %40, %43, %46, %49 in 1 : vector<64x128xbf16>, vector<64x128xbf16>, vector<64x128xbf16>, vector<64x128xbf16>, vector<64x128xbf16>, vector<64x128xbf16>, vector<64x128xbf16>, vector<64x128xbf16>, vector<64x128xbf16> -> vector<64x1152xbf16>
    %c0_51 = arith.constant 0 : index
    %c0_52 = arith.constant 0 : index
    %51 = vector.load %arg5[%c0_51, %c0_52] : memref<1152x128xbf16, #tpu.memory_space<vmem>>, vector<1152x128xbf16>
    %cst_53 = arith.constant dense<0.000000e+00> : vector<64x128xf32>
    %52 = tpu.matmul %50, %51, %cst_53 {dimension_numbers = #tpu.dot_dimension_numbers<[1], [0], [0], [1], [0, 0, 1, 1], [], []>} : vector<64x1152xbf16>, vector<1152x128xbf16>, vector<64x128xf32> -> vector<64x128xf32>
    %53 = vector.broadcast %1 : f32 to vector<64x128xf32>
    %54 = arith.addf %52, %53 : vector<64x128xf32>
    %cst_54 = arith.constant 0.000000e+00 : f32
    %55 = vector.broadcast %cst_54 : f32 to vector<64x128xf32>
    %56 = arith.maximumf %54, %55 : vector<64x128xf32>
    %57 = arith.truncf %56 : vector<64x128xf32> to vector<64x128xbf16>
    %c0_55 = arith.constant 0 : index
    %c0_56 = arith.constant 0 : index
    %58 = vector.load %arg6[%c0_55, %c0_56] : memref<128x128xbf16, #tpu.memory_space<vmem>>, vector<128x128xbf16>
    %cst_57 = arith.constant dense<0.000000e+00> : vector<64x128xf32>
    %59 = tpu.matmul %57, %58, %cst_57 {dimension_numbers = #tpu.dot_dimension_numbers<[1], [0], [0], [1], [0, 0, 1, 1], [], []>} : vector<64x128xbf16>, vector<128x128xbf16>, vector<64x128xf32> -> vector<64x128xf32>
    %c0_58 = arith.constant 0 : index
    %c0_59 = arith.constant 0 : index
    %60 = vector.load %arg7[%c0_58, %c0_59] : memref<1x128xf32, #tpu.memory_space<vmem>>, vector<1x128xf32>
    %61 = vector.broadcast %60 : vector<1x128xf32> to vector<64x128xf32>
    %62 = arith.addf %59, %61 : vector<64x128xf32>
    %63 = arith.addf %62, %4 : vector<64x128xf32>
    %cst_60 = arith.constant 0.000000e+00 : f32
    %64 = vector.broadcast %cst_60 : f32 to vector<64x128xf32>
    %65 = arith.maximumf %63, %64 : vector<64x128xf32>
    %66 = vector.shape_cast %65 : vector<64x128xf32> to vector<8x8x128xf32>
    %c0_61 = arith.constant 0 : index
    %c0_62 = arith.constant 0 : index
    %c0_63 = arith.constant 0 : index
    %c0_64 = arith.constant 0 : index
    %67 = vector.load %arg8[%c0_61, %c0_62, %c0_63, %c0_64] : memref<1x8x8x128xf32, #tpu.memory_space<vmem>>, vector<1x8x8x128xf32>
    %68 = vector.shape_cast %67 : vector<1x8x8x128xf32> to vector<8x8x128xf32>
    %69 = vector.shape_cast %66 : vector<8x8x128xf32> to vector<1x8x8x128xf32>
    tpu.vector_store %arg8[%c0_61, %c0_62, %c0_63, %c0_64], %69 {strides = array<i32>} : memref<1x8x8x128xf32, #tpu.memory_space<vmem>>, vector<1x8x8x128xf32>,
    return
  }
  func.func @transform_0(%arg0: i32) -> i32 {
    %c0_i32 = arith.constant 0 : i32
    %c0_i32_0 = arith.constant 0 : i32
    return %c0_i32 : i32
  }
  func.func @transform_1(%arg0: i32) -> (i32, i32, i32, i32) {
    %c0_i32 = arith.constant 0 : i32
    %c0_i32_0 = arith.constant 0 : i32
    %c0_i32_1 = arith.constant 0 : i32
    %c0_i32_2 = arith.constant 0 : i32
    return %arg0, %c0_i32, %c0_i32_0, %c0_i32_1 : i32, i32, i32, i32
  }
  func.func @transform_2(%arg0: i32) -> (i32, i32) {
    %c0_i32 = arith.constant 0 : i32
    %c0_i32_0 = arith.constant 0 : i32
    %c0_i32_1 = arith.constant 0 : i32
    return %c0_i32, %c0_i32_0 : i32, i32
  }
  func.func @transform_3(%arg0: i32) -> (i32, i32) {
    %c0_i32 = arith.constant 0 : i32
    %c0_i32_0 = arith.constant 0 : i32
    %c0_i32_1 = arith.constant 0 : i32
    return %c0_i32, %c0_i32_0 : i32, i32
  }
  func.func @transform_4(%arg0: i32) -> (i32, i32) {
    %c0_i32 = arith.constant 0 : i32
    %c0_i32_0 = arith.constant 0 : i32
    %c0_i32_1 = arith.constant 0 : i32
    return %c0_i32, %c0_i32_0 : i32, i32
  }
  func.func @transform_5(%arg0: i32) -> (i32, i32) {
    %c0_i32 = arith.constant 0 : i32
    %c0_i32_0 = arith.constant 0 : i32
    %c0_i32_1 = arith.constant 0 : i32
    return %c0_i32, %c0_i32_0 : i32, i32
  }
  func.func @transform_6(%arg0: i32) -> (i32, i32) {
    %c0_i32 = arith.constant 0 : i32
    %c0_i32_0 = arith.constant 0 : i32
    %c0_i32_1 = arith.constant 0 : i32
    return %c0_i32, %c0_i32_0 : i32, i32
  }
  func.func @transform_7(%arg0: i32) -> (i32, i32, i32, i32) {
    %c0_i32 = arith.constant 0 : i32
    %c0_i32_0 = arith.constant 0 : i32
    %c0_i32_1 = arith.constant 0 : i32
    %c0_i32_2 = arith.constant 0 : i32
    return %arg0, %c0_i32, %c0_i32_0, %c0_i32_1 : i32, i32, i32, i32
  }
}

</mosaic_0001>

<bundles_post_ra>
// kernel: tpu_custom_call.1
= control target key start
LH: loop header
LB: loop body
LE: loop exit
PB: predicated region body
PF: predicated region fallthrough
CT: control target
= control target key end

     0   :  { %12 = vsyncpa [#allocation6], 0  ;;  %s3157_s0 = inlined_call_operand.hbm [shape: f32[2], index: 0, kind: input, shape index: {}]   ;;  %s3158_s1 = inlined_call_operand.hbm [shape: f32[2,8,8,128], index: 1, kind: input, shape index: {}]   ;;  %s3159_s2 = inlined_call_operand.hbm [shape: bf16[128,128], index: 2, kind: input, shape index: {}]   ;;  %s3160_s3 = inlined_call_operand.vmem [shape: f32[1,128], index: 3, kind: input, shape index: {}]   ;;  %s3161_s4 = inlined_call_operand.hbm [shape: bf16[1152,128], index: 4, kind: input, shape index: {}]   ;;  %s3162_s5 = inlined_call_operand.hbm [shape: bf16[128,128], index: 5, kind: input, shape index: {}]   ;;  %s3163_s6 = inlined_call_operand.vmem [shape: f32[1,128], index: 6, kind: input, shape index: {}]   ;;  %s3164_s7 = inlined_call_operand.hbm [shape: f32[2,8,8,128], index: 7, kind: output, shape index: {}]  }
   0x1   :  { %13 = vsyncpa [#allocation4], 0 }
   0x2   :  { %15 = vsyncpa [#allocation4 + $0x1], 0 }
   0x3   :  { %16 = vsyncpa [#allocation9], 0 }
   0x4   :  { %17 = vsyncpa [#allocation12], 0 }
   0x5   :  { %18 = vsyncpa [#allocation5], 0 }
   0x6   :  { %20 = vsyncpa [#allocation5 + $0x1], 0  ;;  %s2711_s24 = smov 0   ;;  %s2713_s25 = smov 0  }
   0x7   :  { %s2715_s26 = smov 0   ;;  %s2717_s27 = smov 0  }
   0x8 LB: > { %s2732_s28 = sadd.s32 4294967295, %s2656_s27   ;;  %s1862_s29 = sadd.s32 4294967294, %s2656_s27   ;;  %s2656_s27 = sphi %s2717_s27, %s3192_s27   ;;  %s2652_s26 = sphi %s2715_s26, %s3191_s26   ;;  %s2648_s25 = sphi %s2713_s25, %s3190_s25   ;;  %s2644_s24 = sphi %s2711_s24, %s3189_s24  }
   0x9   : > { %p67_p0 = scmp.ne.s32.totalorder %s2648_s25, %s2644_s24  ;;  %p3165_p1 = scmp.eq.s32.totalorder %s2732_s28, 0 }
   0xa   : > { %p202_p3 = scmp.eq.s32.totalorder %s1862_s29, 1  ;;  %p1863_p5 = scmp.ge.s32.totalorder %s2656_s27, 1 }
   0xb   : > { %p2741_p4 = por %p3165_p1, %p67_p0  ;;  %p209_p7 = scmp.lt.s32.totalorder %s2656_s27, 3 }
   0xc   : > { %p2746_p6 = por %p202_p3, %p67_p0  ;;  %s2658_s10 = smov [#allocation8]  }
   0xd   : > { %s3169_s30 = scalar_select %p2741_p4, 1, 0 }
   0xe   : > { %s3170_s8 = scalar_select %p2746_p6, 1, 0 }
   0xf   : > { %p2751_p8 = pnand %p1863_p5, %p209_p7  ;;  %s230_s11 = sshll.u32 %s2658_s10, 4  ;;  %s2755_s11 = int_to_ptr.vmem [resolvable:$true] %s230_s11 }
  0x10   : > { %3171 = sst [smem:[#allocation19_spill]] %s3170_s8  ;;  %s2659_s13 = smov [#allocation10]  }
  0x11   : > { %s3172_s9 = scalar_select %p2751_p8, 1, 0 }
  0x12   : > { %p2281_p9 = pneg %p2751_p8  ;;  %s246_s14 = sshll.u32 %s2659_s13, 4  ;;  %s2766_s14 = int_to_ptr.vmem [resolvable:$true] %s246_s14 }
  0x13   : > { %s2451_s17 = scalar_lea.hbm %s3159_s2, 1024 }
  0x14   : > { %p2762_p11 = pnand %p2281_p9, %p3165_p1  ;;  %p2452_p12 = scmp.ne.s32.totalorder %s3159_s2, %s2451_s17 }
  0x15   : > { %p2458_p5 = scmp.lt.u32.totalorder %s2451_s17, %s3159_s2 }
  0x16   : > { %p2776_p13 = pneg %p2762_p11 }
  0x18   : > { %p2454_p0 = pnand %p2776_p13, %p2452_p12 }
  0x1a   : > { %p2455_p3 = pneg %p2454_p0 }
  0x1c   : > { %p2460_p7 = pnand %p2458_p5, %p2455_p3 }
  0x1e   : > { %2463 = shalt.err (!%p2460_p7)
}
  0x1f   : > { %s2464_s23 = scalar_lea.vmem %s2755_s11, 1024  ;;  %p2472_p2 = scmp.lt.s32.totalorder %s2755_s11, %s2755_s11 }
  0x20   : > { %p2465_p9 = scmp.ne.s32.totalorder %s2755_s11, %s2464_s23  ;;  %p2473_p6 = scmp.lt.s32.totalorder %s2464_s23, %s2464_s23 }
  0x22   : > { %p2467_p10 = pnand %p2465_p9, %p2776_p13  ;;  %p2474_p12 = por %p2473_p6, %p2472_p2 }
  0x24   : > { %p2468_p1 = pneg %p2467_p10 }
  0x26   : > { %p2475_p0 = pnand %p2474_p12, %p2468_p1 }
  0x28   : > { %2478 = shalt.err (!%p2475_p0)
}
  0x29   : > { %s2660_s29 = smov 64   ;;  %s2661_s10 = smov 4  }
  0x2a   : > { %2287 = dma.hbm_to_vmem [thread:$0]  (!%p2762_p11), %s3159_s2, 1024, %s2755_s11, [#allocation9], %s2660_s29, %s2660_s29, %s2661_s10  }
  0x2b   : > { %s2479_s18 = scalar_lea.hbm %s3157_s0, 16 }
  0x2c   : > { %p2480_p1 = scmp.ne.s32.totalorder %s3157_s0, %s2479_s18  ;;  %p2486_p10 = scmp.lt.u32.totalorder %s2479_s18, %s3157_s0 }
  0x2e   : > { %p2482_p2 = pnand %p2480_p1, %p2776_p13 }
  0x30   : > { %p2483_p6 = pneg %p2482_p2 }
  0x32   : > { %p2488_p3 = pnand %p2486_p10, %p2483_p6 }
  0x34   : > { %2491 = shalt.err (!%p2488_p3)
}
  0x35   : > { %s2662_s8 = smov [#allocation3]   ;;  %s2492_s17 = scalar_lea.hbm %s3161_s4, 9216 }
  0x36   : > { %2284 = dma.hbm_to_smem (!%p2762_p11), %s3157_s0, 16, %s2662_s8, [#allocation6]  }
  0x37   : > { %p2493_p5 = scmp.ne.s32.totalorder %s3161_s4, %s2492_s17  ;;  %p2499_p12 = scmp.lt.u32.totalorder %s2492_s17, %s3161_s4 }
  0x39   : > { %p2495_p7 = pnand %p2493_p5, %p2776_p13 }
  0x3b   : > { %p2496_p9 = pneg %p2495_p7 }
  0x3d   : > { %p2501_p0 = pnand %p2499_p12, %p2496_p9 }
  0x3f   : > { %2504 = shalt.err (!%p2501_p0)
}
  0x40   : > { %s2505_s8 = scalar_lea.vmem %s2766_s14, 9216  ;;  %p2513_p10 = scmp.lt.s32.totalorder %s2766_s14, %s2766_s14 }
  0x41   : > { %p2506_p1 = scmp.ne.s32.totalorder %s2766_s14, %s2505_s8  ;;  %p2514_p3 = scmp.lt.s32.totalorder %s2505_s8, %s2505_s8 }
  0x43   : > { %p2508_p2 = pnand %p2506_p1, %p2776_p13  ;;  %p2515_p5 = por %p2514_p3, %p2513_p10 }
  0x45   : > { %p2509_p6 = pneg %p2508_p2 }
  0x47   : > { %p2516_p7 = pnand %p2515_p5, %p2509_p6 }
  0x49   : > { %2519 = shalt.err (!%p2516_p7)
}
  0x4a   : > { %2290 = dma.hbm_to_vmem [thread:$0]  (!%p2762_p11), %s3161_s4, 9216, %s2766_s14, [#allocation9], %s2660_s29, %s2660_s29, %s2661_s10  }
  0x4b   : > { %s2663_s13 = smov [#allocation11]   ;;  %s2520_s19 = scalar_lea.hbm %s3162_s5, 1024 }
  0x4c   : > { %s259_s15 = sshll.u32 %s2663_s13, 4  ;;  %p2521_p9 = scmp.ne.s32.totalorder %s3162_s5, %s2520_s19  ;;  %s260_s15 = int_to_ptr.vmem [resolvable:$true] %s259_s15 }
  0x4d   : > { %p2527_p1 = scmp.lt.u32.totalorder %s2520_s19, %s3162_s5 }
  0x4e   : > { %p2523_p12 = pnand %p2521_p9, %p2776_p13 }
  0x50   : > { %p2524_p0 = pneg %p2523_p12 }
  0x52   : > { %p2529_p2 = pnand %p2527_p1, %p2524_p0 }
  0x54   : > { %2532 = shalt.err (!%p2529_p2)
}
  0x55   : > { %s2533_s14 = scalar_lea.vmem %s260_s15, 1024  ;;  %p2541_p5 = scmp.lt.s32.totalorder %s260_s15, %s260_s15 }
  0x56   : > { %p2534_p6 = scmp.ne.s32.totalorder %s260_s15, %s2533_s14  ;;  %p2542_p7 = scmp.lt.s32.totalorder %s2533_s14, %s2533_s14 }
  0x58   : > { %p2536_p10 = pnand %p2534_p6, %p2776_p13  ;;  %p2543_p4 = por %p2542_p7, %p2541_p5 }
  0x5a   : > { %p2537_p3 = pneg %p2536_p10 }
  0x5c   : > { %p2544_p8 = pnand %p2543_p4, %p2537_p3 }
  0x5e   : > { %2547 = shalt.err (!%p2544_p8)
}
  0x5f   : > { %2293 = dma.hbm_to_vmem [thread:$0]  (!%p2762_p11), %s3162_s5, 1024, %s260_s15, [#allocation12], %s2660_s29, %s2660_s29, %s2661_s10  }
  0x60   : > { %s2864_s20 = sadd.s32 1, %s2656_s27   ;;  %s54_s12 = sadd.s32 1, %s2652_s26 }
  0x61   : > { %s51_s13 = ssub.s32 %s2656_s27, %s2864_s20  ;;  %p61_p4 = scmp.ne.s32.totalorder %s2652_s26, %s2648_s25 }
  0x62   : > { %p52_p8 = scmp.eq.s32.totalorder %s51_s13, 0  ;;  %p62_p13 = scmp.eq.s32.totalorder %s2656_s27, 0 }
  0x63   : > { %p3175_p9 = scmp.eq.s32.totalorder %s2732_s28, 1  ;;  %p2306_p0 = scmp.lt.s32.totalorder %s2656_s27, 2 }
  0x64   : > { %s2880_s17 = scalar_select %p52_p8, %s2652_s26, %s54_s12  }
  0x65   : > { %p2874_p12 = por %p3175_p9, %p61_p4  ;;  %p63_p1 = por %p62_p13, %p61_p4 }
  0x66   : > { %s276_s19 = sand.u32 1, %s2652_s26   ;;  %s1975_s29 = sshll.u32 %s2656_s27, 10 }
  0x67   : > { %s1869_s21 = sshll.u32 %s276_s19, 6  ;;  %s2887_s18 = scalar_lea.hbm %s3158_s1, %s1975_s29 }
  0x68   : > { %s280_s22 = scalar_lea.vmem [#allocation7], %s1869_s21  ;;  %p2891_p11 = pnand %p2306_p0, %p63_p1 }
  0x69   : > { %s287_s8 = sshll.u32 %s280_s22, 4  ;;  %s2895_s23 = scalar_lea.sflag [#allocation4], %s276_s19  ;;  %s2889_s8 = int_to_ptr.vmem [resolvable:$true] %s287_s8 }
  0x6a   : > { %s2548_s11 = scalar_lea.hbm %s2887_s18, 1024  ;;  %p2550_p6 = pneg %p2891_p11 }
  0x6b   : > { %p2549_p2 = scmp.ne.s32.totalorder %s2887_s18, %s2548_s11  ;;  %s2553_s21 = scalar_lea.hbm %s3158_s1, 2048 }
  0x6c   : > { %p2554_p5 = scmp.lt.u32.totalorder %s2887_s18, %s3158_s1  ;;  %p2555_p7 = scmp.lt.u32.totalorder %s2553_s21, %s2548_s11 }
  0x6d   : > { %p2551_p10 = pnand %p2550_p6, %p2549_p2  ;;  %p2557_p8 = scmp.lt.u32.totalorder %s2548_s11, %s2887_s18 }
  0x6e   : > { %p2556_p4 = por %p2555_p7, %p2554_p5 }
  0x6f   : > { %p2552_p3 = pneg %p2551_p10 }
  0x70   : > { %p2558_p13 = por %p2557_p8, %p2556_p4 }
  0x72   : > { %p2559_p9 = pnand %p2558_p13, %p2552_p3 }
  0x74   : > { %2562 = shalt.err (!%p2559_p9)
}
  0x75   : > { %s2563_s19 = scalar_lea.vmem %s2889_s8, 1024  ;;  %s2664_s15 = smov [#allocation7]  }
  0x76   : > { %p2564_p0 = scmp.ne.s32.totalorder %s2889_s8, %s2563_s19  ;;  %s2568_s22 = sshll.u32 %s2664_s15, 4  ;;  %s2569_s22 = int_to_ptr.vmem [resolvable:$false] %s2568_s22 }
  0x77   : > { %s2570_s12 = scalar_lea.vmem %s2569_s22, 2048  ;;  %p2571_p10 = scmp.lt.s32.totalorder %s2889_s8, %s2569_s22 }
  0x78   : > { %p2566_p1 = pnand %p2564_p0, %p2550_p6  ;;  %p2572_p5 = scmp.lt.s32.totalorder %s2570_s12, %s2563_s19 }
  0x7a   : > { %p2567_p2 = pneg %p2566_p1  ;;  %p2573_p7 = por %p2572_p5, %p2571_p10 }
  0x7c   : > { %p2574_p4 = pnand %p2573_p7, %p2567_p2 }
  0x7e   : > { %2577 = shalt.err (!%p2574_p4)
}
  0x7f   : > { %s2665_s11 = smov 128   ;;  %s2666_s13 = smov 8  }
  0x80   : > { %2297 = dma.hbm_to_vmem [thread:$0]  (!%p2891_p11), %s2887_s18, 1024, %s2889_s8, %s2895_s23, %s2665_s11, %s2665_s11, %s2666_s13  }
  0x81   : > { %p3178_p6 = scmp.ne.s32.totalorder %s3172_s9, 0 }
  0x82   : > { %p3179_p3 = scmp.eq.s32.totalorder (!%p3178_p6), %s2732_s28, 0 }
  0x83   : > { %299 = sbr.rel (%p3178_p6) target bundleno = 944 (0x3b0), region = 48 }
  0x8a   : > { %2623 = dma.done.wait (%p3179_p3), [#allocation6], 16   ;;  %p3180_p8 = pmov %p3179_p3 }
  0x8b   : > { %s2930_s21 = sand.u32 1, %s2648_s25   ;;  %p3181_p11 = scmp.ne.s32.totalorder %s3169_s30, 0 }
  0x8c   : > { %2625 = vsyncadd (%p3180_p8), [#allocation6], 4294967280  ;;  %s1874_s29 = sshll.u32 %s2930_s21, 6  ;;  %s306_s10 = scalar_lea.sflag [#allocation4], %s2930_s21 }
  0x8d   : > { %s2936_s18 = scalar_lea.vmem [#allocation7], %s1874_s29 }
  0x8e   : > { %2627 = dma.done.wait (%p3181_p11), %s306_s10, 1024  }
  0x8f   : > { %2629 = vsyncadd (%p3181_p11), %s306_s10, 4294966272  ;;  %p3182_p13 = pmov %p3179_p3 }
  0x90   : > { %p3183_p9 = pmov %p3179_p3 }
  0x91   : > { %2631 = dma.done.wait (%p3182_p13), [#allocation9], 10240  }
  0x92   : > { %2633 = vsyncadd (%p3183_p9), [#allocation9], 4294957056  ;;  %p3184_p0 = pmov %p3179_p3 }
  0x94   : > { %2635 = dma.done.wait (%p3184_p0), [#allocation12], 1024   ;;  %p3185_p1 = pmov %p3184_p0 }
  0x96   : > { %2637 = vsyncadd (%p3185_p1), [#allocation12], 4294966272 }
  0x97   : > { %326 = sfence }
  0x98   : > { %v2355_v0 = vld [vmem:[#allocation8] sm:$0xff]   ;;  %v2356_v1 = vld [vmem:[#allocation8 + $0x8] sm:$0xff]   ;;  %v2357_v2 = vld [vmem:[#allocation8 + $0x10] sm:$0xff]   ;;  %v2667_v37 = vmov 0.0   ;;  %s354_s30 = sld [smem:[#allocation3]]  ;;  %s1879_s14 = sld [smem:[#allocation3 + $0x1]] }
  0x99   : > { %2173 = vmatprep.subr.bf16.mxu0 %v2355_v0  ;;  %v2358_v3 = vld [vmem:[#allocation8 + $0x18] sm:$0xff]   ;;  %v356_v4 = vld [vmem:[%s2936_s18] sm:$0xff]  ;;  %v357_v5 = vld [vmem:[%s2936_s18 + $0x8] sm:$0xff]  ;;  %512 = vst [vmem:[#allocation2] sm:$0xff] %v2667_v37  ;;  %s3092_s15 = scalar_lea.vmem [#allocation13], %s1874_s29  ;;  %s1976_s22 = sshll.u32 %s2732_s28, 10 }
  0x9a   : > { %2174 = vmatpush3.bf16.msra.mxu0 %v2355_v0  ;;  %v364_v6 = vpack.c.bf16 %v357_v5, %v356_v4  ;;  %v2359_v7 = vld [vmem:[#allocation8 + $0x20] sm:$0xff]   ;;  %v2366_v10 = vld [vmem:[#allocation10 + $0x48] sm:$0xff]   ;;  %v2370_v13 = vld [vmem:[#allocation10 + $0x50] sm:$0xff]   ;;  %513 = vst [vmem:[#allocation2 + $0x8] sm:$0x3] %v2667_v37  ;;  %s1748_s12 = sshll.u32 %s3092_s15, 4  ;;  %s3108_s29 = scalar_lea.hbm %s3164_s7, %s1976_s22  ;;  %s3110_s12 = int_to_ptr.vmem [resolvable:$true] %s1748_s12 }
  0x9b   : > { %2175 = vmatprep.subr.bf16.mxu0 %v2356_v1  ;;  %v2363_v8 = vld [vmem:[#allocation10 + $0x40] sm:$0xff]   ;;  %v2360_v11 = vld [vmem:[#allocation8 + $0x28] sm:$0xff]   ;;  %v2361_v14 = vld [vmem:[#allocation8 + $0x30] sm:$0xff]   ;;  %515 = vst [vmem:[#allocation2 + $0x90] sm:$0xff] %v2667_v37  ;;  %s1735_s28 = scalar_lea.sflag [#allocation5], %s2930_s21  ;;  %s2578_s10 = scalar_lea.vmem %s3110_s12, 1024 }
  0x9c   : > { %2189 = vmatprep.mubr.bf16.mxu0 %v364_v6  ;;  %v2364_v9 = vld [vmem:[#allocation10] sm:$0xff]   ;;  %1989 = vmatprep.subr.bf16.mxu1 %v2363_v8  ;;  %v2368_v12 = vld [vmem:[#allocation10 + $0x8] sm:$0xff]   ;;  %v2372_v15 = vld [vmem:[#allocation10 + $0x10] sm:$0xff]   ;;  %516 = vst [vmem:[#allocation2 + $0x98] sm:$0x3] %v2667_v37  ;;  %p2579_p2 = scmp.ne.s32.totalorder %s3110_s12, %s2578_s10 }
  0x9d   : > { %1990 = vmatpush3.bf16.msra.mxu1 %v2364_v9  ;;  %v2374_v16 = vld [vmem:[#allocation10 + $0x58] sm:$0xff]   ;;  %v358_v19 = vld [vmem:[%s2936_s18 + $0x10] sm:$0xff]  ;;  %v360_v21 = vld [vmem:[%s2936_s18 + $0x20] sm:$0xff]  ;;  %518 = vst [vmem:[#allocation2 + $0x10] sm:$0x1] %v2667_v37 }
  0x9e   : > { %2176 = vmatpush3.bf16.msra.mxu0 %v2356_v1  ;;  %1991 = vmatprep.subr.bf16.mxu1 %v2366_v10  ;;  %v2362_v17 = vld [vmem:[#allocation8 + $0x38] sm:$0xff]   ;;  %v361_v22 = vld [vmem:[%s2936_s18 + $0x28] sm:$0xff]  ;;  %v2365_v23 = vld [vmem:[#allocation10 + $0xc0] sm:$0xff]   ;;  %519 = vst [vmem:[#allocation2 + $0x20] sm:$0x1] %v2667_v37  ;;  %v534_v59 = vstv %s354_s30  ;;  %p2580_p10 = pnand %p2579_p2, %p2874_p12 }
  0x9f   : > { %2177 = vmatprep.subr.bf16.mxu0 %v2357_v2  ;;  %v2376_v18 = vld [vmem:[#allocation10 + $0x18] sm:$0xff]   ;;  %v2367_v24 = vld [vmem:[#allocation10 + $0x80] sm:$0xff]   ;;  %v2369_v26 = vld [vmem:[#allocation10 + $0xc8] sm:$0xff]   ;;  %v366_v27 = vpack.c.bf16 %v361_v22, %v360_v21  ;;  %520 = vst [vmem:[#allocation2 + $0x30] sm:$0x1] %v2667_v37 }
  0xa0   : > { %v359_v20 = vld [vmem:[%s2936_s18 + $0x18] sm:$0xff]  ;;  %v362_v28 = vld [vmem:[%s2936_s18 + $0x30] sm:$0xff]  ;;  %v2371_v30 = vld [vmem:[#allocation10 + $0x88] sm:$0xff]   ;;  %521 = vst [vmem:[#allocation2 + $0x40] sm:$0x1] %v2667_v37  ;;  %p2581_p5 = pneg %p2580_p10 }
  0xa1   : > { %1992 = vmatpush3.bf16.msra.mxu1 %v2368_v12  ;;  %v365_v25 = vpack.c.bf16 %v359_v20, %v358_v19  ;;  %v363_v29 = vld [vmem:[%s2936_s18 + $0x38] sm:$0xff]  ;;  %v2373_v31 = vld [vmem:[#allocation10 + $0xd0] sm:$0xff]   ;;  %v2378_v35 = vld [vmem:[#allocation10 + $0x60] sm:$0xff]   ;;  %522 = vst [vmem:[#allocation2 + $0x50] sm:$0x1] %v2667_v37 }
  0xa2   : > { %2178 = vmatpush3.bf16.msra.mxu0 %v2357_v2  ;;  %1993 = vmatprep.subr.bf16.mxu1 %v2370_v13  ;;  %v2375_v32 = vld [vmem:[#allocation10 + $0x90] sm:$0xff]   ;;  %v367_v33 = vpack.c.bf16 %v363_v29, %v362_v28  ;;  %v2377_v34 = vld [vmem:[#allocation10 + $0xd8] sm:$0xff]   ;;  %523 = vst [vmem:[#allocation2 + $0x60] sm:$0x1] %v2667_v37  ;;  %524 = vst [vmem:[#allocation2 + $0x70] sm:$0x1] %v2667_v37 }
  0xa3   : > { %2179 = vmatprep.subr.bf16.mxu0 %v2358_v3  ;;  %v2379_v36 = vld [vmem:[#allocation10 + $0x98] sm:$0xff]   ;;  %525 = vst [vmem:[#allocation2 + $0x80] sm:$0x1] %v2667_v37  ;;  %526 = vst [vmem:[#allocation2 + $0x19] sm:$0x1] %v2667_v37  ;;  %v2380_v38 = vld [vmem:[#allocation10 + $0x20] sm:$0xff]  }
  0xa4   : > { %527 = vst [vmem:[#allocation2 + $0x29] sm:$0x1] %v2667_v37  ;;  %528 = vst [vmem:[#allocation2 + $0x39] sm:$0x1] %v2667_v37  ;;  %v2381_v39 = vld [vmem:[#allocation10 + $0xe0] sm:$0xff]   ;;  %v2382_v40 = vld [vmem:[#allocation10 + $0x68] sm:$0xff]  }
  0xa5   : > { %1994 = vmatpush3.bf16.msra.mxu1 %v2372_v15  ;;  %529 = vst [vmem:[#allocation2 + $0x49] sm:$0x1] %v2667_v37  ;;  %530 = vst [vmem:[#allocation2 + $0x59] sm:$0x1] %v2667_v37  ;;  %v2383_v41 = vld [vmem:[#allocation10 + $0xa0] sm:$0xff]   ;;  %v2384_v42 = vld [vmem:[#allocation10 + $0x28] sm:$0xff]  }
  0xa6   : > { %2180 = vmatpush3.bf16.msra.mxu0 %v2358_v3  ;;  %1995 = vmatprep.subr.bf16.mxu1 %v2374_v16  ;;  %531 = vst [vmem:[#allocation2 + $0x69] sm:$0x1] %v2667_v37  ;;  %532 = vst [vmem:[#allocation2 + $0x79] sm:$0x1] %v2667_v37  ;;  %v2385_v43 = vld [vmem:[#allocation10 + $0xe8] sm:$0xff]   ;;  %v2386_v44 = vld [vmem:[#allocation10 + $0x70] sm:$0xff]  }
  0xa7   : > { %2181 = vmatprep.subr.bf16.mxu0 %v2359_v7  ;;  %533 = vst [vmem:[#allocation2 + $0x89] sm:$0x1] %v2667_v37  ;;  %v2387_v45 = vld [vmem:[#allocation10 + $0xa8] sm:$0xff]   ;;  %v2388_v46 = vld [vmem:[#allocation10 + $0x30] sm:$0xff]   ;;  %v2390_v48 = vld [vmem:[#allocation10 + $0x78] sm:$0xff]  }
  0xa8   : > { %v2389_v47 = vld [vmem:[#allocation10 + $0xf0] sm:$0xff]   ;;  %v2392_v50 = vld [vmem:[#allocation10 + $0x38] sm:$0xff]   ;;  %v2395_v53 = vld [vmem:[#allocation10 + $0x140] sm:$0xff]  }
  0xa9   : > { %1996 = vmatpush3.bf16.msra.mxu1 %v2376_v18  ;;  %v2391_v49 = vld [vmem:[#allocation10 + $0xb0] sm:$0xff]   ;;  %v2393_v51 = vld [vmem:[#allocation10 + $0xf8] sm:$0xff]   ;;  %v2397_v54 = vld [vmem:[#allocation10 + $0x1c0] sm:$0xff]  }
  0xaa   : > { %2182 = vmatpush3.bf16.msra.mxu0 %v2359_v7  ;;  %1997 = vmatprep.subr.bf16.mxu1 %v2378_v35  ;;  %v2394_v52 = vld [vmem:[#allocation10 + $0xb8] sm:$0xff]   ;;  %v1880_v55 = vld [vmem:[%s3160_s3] ss:$0 sm:$0xff]  ;;  %v563_v5 = vld [vmem:[#allocation2 + $0x1] sm:$0xff] }
  0xab   : > { %2183 = vmatprep.subr.bf16.mxu0 %v2360_v11  ;;  %v2398_v35 = vld [vmem:[#allocation10 + $0x148] sm:$0xff]  }
  0xad   : > { %1998 = vmatpush3.bf16.msra.mxu1 %v2380_v38 }
  0xae   : > { %2184 = vmatpush3.bf16.msra.mxu0 %v2360_v11  ;;  %1999 = vmatprep.subr.bf16.mxu1 %v2382_v40 }
  0xaf   : > { %2185 = vmatprep.subr.bf16.mxu0 %v2361_v14 }
  0xb1   : > { %2000 = vmatpush3.bf16.msra.mxu1 %v2384_v42  ;;  %v2399_v42 = vld [vmem:[#allocation10 + $0x180] sm:$0xff]  }
  0xb2   : > { %2186 = vmatpush3.bf16.msra.mxu0 %v2361_v14  ;;  %2001 = vmatprep.subr.bf16.mxu1 %v2386_v44 }
  0xb3   : > { %2187 = vmatprep.subr.bf16.mxu0 %v2362_v17 }
  0xb5   : > { %2002 = vmatpush3.bf16.msra.mxu1 %v2388_v46  ;;  %v2400_v46 = vld [vmem:[#allocation10 + $0x108] sm:$0xff]  }
  0xb6   : > { %2188 = vmatpush3.bf16.msra.mxu0 %v2362_v17  ;;  %2003 = vmatprep.subr.bf16.mxu1 %v2390_v48 }
  0xb7   : > { %2029 = vmatprep.subr.bf16.mxu0 %v2365_v23 }
  0xb9   : > { %2190 = vmatmul.mubr.bf16.vlgmr.msra.gmra.mrb[0].mxu0 %v365_v25  ;;  %2004 = vmatpush3.bf16.msra.mxu1 %v2392_v50  ;;  %v2402_v50 = vld [vmem:[#allocation10 + $0x150] sm:$0xff]  }
  0xba   : > { %2193 = vmatprep.mubr.bf16.mxu0 %v366_v27  ;;  %2030 = vmatpush3.bf16.msra.mxu0 %v2367_v24 }
  0xbb   : > { %2031 = vmatprep.subr.bf16.mxu0 %v2369_v26  ;;  %2069 = vmatprep.subr.bf16.mxu1 %v2395_v53 }
  0xbe   : > { %2032 = vmatpush3.bf16.msra.mxu0 %v2371_v30  ;;  %v2396_v30 = vld [vmem:[#allocation10 + $0x100] sm:$0xff]  }
  0xbf   : > { %2033 = vmatprep.subr.bf16.mxu0 %v2373_v31 }
  0xc1   : > { %2194 = vmatmul.mubr.bf16.gmra.mrb[4].mxu0 %v367_v33  ;;  %v575_v33 = vld [vmem:[#allocation2 + $0x2] sm:$0xff] }
  0xc2   : > { %2034 = vmatpush3.bf16.msra.mxu0 %v2375_v32 }
  0xc3   : > { %2035 = vmatprep.subr.bf16.mxu0 %v2377_v34 }
  0xc6   : > { %2036 = vmatpush3.bf16.msra.mxu0 %v2379_v36 }
  0xc7   : > { %2037 = vmatprep.subr.bf16.mxu0 %v2381_v39 }
  0xca   : > { %2038 = vmatpush3.bf16.msra.mxu0 %v2383_v41 }
  0xcb   : > { %2039 = vmatprep.subr.bf16.mxu0 %v2385_v43 }
  0xce   : > { %2040 = vmatpush3.bf16.msra.mxu0 %v2387_v45 }
  0xcf   : > { %2041 = vmatprep.subr.bf16.mxu0 %v2389_v47  ;;  %v2401_v47 = vld [vmem:[#allocation10 + $0x1c8] sm:$0xff]  }
  0xd2   : > { %2042 = vmatpush3.bf16.msra.mxu0 %v2391_v49 }
  0xd3   : > { %2043 = vmatprep.subr.bf16.mxu0 %v2393_v51  ;;  %v2403_v51 = vld [vmem:[#allocation10 + $0x188] sm:$0xff]  }
  0xd6   : > { %2044 = vmatpush3.bf16.msra.mxu0 %v2394_v52  ;;  %v2404_v52 = vld [vmem:[#allocation10 + $0x110] sm:$0xff]  }
  0xd7   : > { %2109 = vmatprep.subr.bf16.mxu0 %v2397_v54 }
 0x18c   : > { %v2191_v56 = vpop.f32.mrb[0].mxu0 }
 0x18d   : > { %v482_v57 = vadd.f32 %v2191_v56, %v1880_v55  ;;  %v473_v58 = vpop.f32.mrb[1].mxu0  ;;  %v2406_v56 = vld [vmem:[#allocation10 + $0x158] sm:$0xff]  }
 0x18e   : > { %v474_v60 = vadd.f32 %v1880_v55, %v473_v58  ;;  %v2192_v61 = vpop.f32.mrb[2].mxu0 }
 0x18f   : > { %v506_v62 = vmax.f32 %v482_v57, 0.0  ;;  %v485_v63 = vadd.f32 %v2192_v61, %v1880_v55  ;;  %v476_v0 = vpop.f32.mrb[3].mxu0 }
 0x190   : > { %v504_v1 = vmax.f32 %v474_v60, 0.0  ;;  %v477_v2 = vadd.f32 %v1880_v55, %v476_v0  ;;  %v2407_v60 = vld [vmem:[#allocation10 + $0x190] sm:$0xff]   ;;  %v2409_v0 = vld [vmem:[#allocation10 + $0x1d8] sm:$0xff]  }
 0x191   : > { %v2981_v3 = vadd.f32 %v534_v59, %v506_v62  ;;  %v507_v4 = vmax.f32 %v485_v63, 0.0  ;;  %v2408_v63 = vld [vmem:[#allocation10 + $0x118] sm:$0xff]  }
 0x192   : > { %v2983_v6 = vadd.f32 %v534_v59, %v504_v1  ;;  %v505_v7 = vmax.f32 %v477_v2, 0.0  ;;  %v2410_v1 = vld [vmem:[#allocation10 + $0x160] sm:$0xff]   ;;  %v2411_v2 = vld [vmem:[#allocation10 + $0x198] sm:$0xff]  }
 0x193   : > { %545 = vst [vmem:[#allocation2 + $0x31] sm:$0xff] %v2981_v3  ;;  %v2986_v8 = vadd.f32 %v534_v59, %v507_v4  ;;  %v2412_v4 = vld [vmem:[#allocation10 + $0x120] sm:$0xff]  }
 0x194   : > { %543 = vst [vmem:[#allocation2 + $0x11] sm:$0xff] %v2983_v6  ;;  %v2989_v9 = vadd.f32 %v534_v59, %v505_v7  ;;  %v2195_v10 = vpop.f32.mrb[4].mxu0  ;;  %v571_v11 = vpack.c.bf16 %v2983_v6, %v563_v5 }
 0x195   : > { %546 = vst [vmem:[#allocation2 + $0x41] sm:$0xff] %v2986_v8  ;;  %v498_v12 = vadd.f32 %v2195_v10, %v1880_v55  ;;  %v489_v13 = vpop.f32.mrb[5].mxu0  ;;  %v608_v14 = vpack.c.bf16 %v2986_v8, %v2981_v3  ;;  %v2413_v10 = vld [vmem:[#allocation10 + $0x1e0] sm:$0xff]  }
 0x196   : > { %544 = vst [vmem:[#allocation2 + $0x21] sm:$0xff] %v2989_v9  ;;  %v490_v15 = vadd.f32 %v1880_v55, %v489_v13  ;;  %v2196_v16 = vpop.f32.mrb[6].mxu0  ;;  %1269 = vmatprep.mubr.bf16.mxu1 %v571_v11  ;;  %v2998_v17 = vpack.c.bf16 %v2981_v3, %v2989_v9  ;;  %v607_v18 = vpack.c.bf16 %v2989_v9, %v2983_v6  ;;  %v2414_v11 = vld [vmem:[#allocation10 + $0x168] sm:$0xff]   ;;  %v2431_v6 = vld [vmem:[#allocation10 + $0x220] sm:$0xff]  }
 0x197   : > { %v510_v19 = vmax.f32 %v498_v12, 0.0  ;;  %v501_v20 = vadd.f32 %v2196_v16, %v1880_v55  ;;  %v492_v21 = vpop.f32.mrb[7].mxu0  ;;  %v2415_v16 = vld [vmem:[#allocation10 + $0x1a0] sm:$0xff]  }
 0x198   : > { %v508_v22 = vmax.f32 %v490_v15, 0.0  ;;  %v493_v23 = vadd.f32 %v1880_v55, %v492_v21  ;;  %v2405_v55 = vld [vmem:[#allocation10 + $0x1d0] sm:$0xff]   ;;  %v2417_v21 = vld [vmem:[#allocation10 + $0x1e8] sm:$0xff]  }
 0x199   : > { %v3002_v24 = vadd.f32 %v534_v59, %v510_v19  ;;  %v511_v25 = vmax.f32 %v501_v20, 0.0  ;;  %v2416_v20 = vld [vmem:[#allocation10 + $0x128] sm:$0xff]  }
 0x19a   : > { %v3004_v26 = vadd.f32 %v534_v59, %v508_v22  ;;  %v509_v27 = vmax.f32 %v493_v23, 0.0  ;;  %v589_v45 = vld [vmem:[#allocation2 + $0x30] sm:$0xff] }
 0x19b   : > { %549 = vst [vmem:[#allocation2 + $0x71] sm:$0xff] %v3002_v24  ;;  %v3007_v28 = vadd.f32 %v534_v59, %v511_v25  ;;  %v552_v29 = vld [vmem:[#allocation2 + $0x10] sm:$0xff]  ;;  %v2419_v25 = vld [vmem:[#allocation10 + $0x1a8] sm:$0xff]  }
 0x19c   : > { %547 = vst [vmem:[#allocation2 + $0x51] sm:$0xff] %v3004_v26  ;;  %v3010_v31 = vadd.f32 %v534_v59, %v509_v27  ;;  %v559_v32 = vpack.c.bf16 %v552_v29, %v2667_v37  ;;  %v3013_v34 = vld [vmem:[#allocation2 + $0x12] sm:$0xff]  ;;  %v3017_v36 = vpack.c.bf16 %v3004_v26, %v2986_v8  ;;  %v590_v39 = vld [vmem:[#allocation2 + $0x40] sm:$0xff] }
 0x19d   : > { %550 = vst [vmem:[#allocation2 + $0x81] sm:$0xff] %v3007_v28  ;;  %v588_v38 = vld [vmem:[#allocation2 + $0x20] sm:$0xff]  ;;  %v610_v40 = vpack.c.bf16 %v3007_v28, %v3002_v24  ;;  %v583_v44 = vpack.c.bf16 %v3013_v34, %v575_v33  ;;  %v596_v49 = vpack.c.bf16 %v590_v39, %v589_v45  ;;  %v3036_v59 = vld [vmem:[#allocation2 + $0x32] sm:$0xff] }
 0x19e   : > { %548 = vst [vmem:[#allocation2 + $0x61] sm:$0xff] %v3010_v31  ;;  %1270 = vmatmul.mubr.bf16.vlgmr.msra.gmra.mrb[0].mxu1 %v559_v32  ;;  %v595_v41 = vpack.c.bf16 %v588_v38, %v552_v29  ;;  %v3025_v43 = vpack.c.bf16 %v3002_v24, %v3010_v31  ;;  %v609_v48 = vpack.c.bf16 %v3010_v31, %v3004_v26  ;;  %v3033_v54 = vld [vmem:[#allocation2 + $0x22] sm:$0xff]  ;;  %v2418_v23 = vld [vmem:[#allocation10 + $0x170] sm:$0xff]  }
 0x19f   : > { %2070 = vmatpush3.bf16.msra.mxu1 %v2396_v30  ;;  %1277 = vmatprep.mubr.bf16.mxu1 %v2998_v17  ;;  %v3031_v53 = vpack.c.bf16 %v589_v45, %v588_v38  ;;  %v3041_v62 = vpack.c.bf16 %v3036_v59, %v3033_v54  ;;  %v579_v15 = vld [vmem:[#allocation2 + $0x42] sm:$0xff]  ;;  %v2420_v27 = vld [vmem:[#allocation10 + $0x130] sm:$0xff]   ;;  %v619_v38 = vpack.c.bf16 %v3033_v54, %v3013_v34  ;;  %v2442_v54 = vld [vmem:[#allocation11 + $0x38] sm:$0xff]  }
 0x1a0   : > { %1334 = vmatprep.mubr.bf16.mxu0 %v595_v41  ;;  %2071 = vmatprep.subr.bf16.mxu1 %v2398_v35  ;;  %v2421_v29 = vld [vmem:[#allocation10 + $0x1f0] sm:$0xff]   ;;  %v2422_v35 = vld [vmem:[#allocation10 + $0x178] sm:$0xff]   ;;  %v2427_v45 = vld [vmem:[#allocation10 + $0x200] sm:$0xff]  }
 0x1a1   : > { %1335 = vmatmul.mubr.bf16.vlgmr.msra.gmra.mrb[8].mxu0 %v583_v44  ;;  %v2425_v44 = vld [vmem:[#allocation10 + $0x1f8] sm:$0xff]   ;;  %v2428_v34 = vld [vmem:[#allocation10 + $0x208] sm:$0xff]   ;;  %v2433_v8 = vld [vmem:[#allocation10 + $0x230] sm:$0xff]  }
 0x1a2   : > { %1342 = vmatprep.mubr.bf16.mxu0 %v596_v49  ;;  %2110 = vmatpush3.bf16.msra.mxu0 %v2399_v42  ;;  %v593_v12 = vld [vmem:[#allocation2 + $0x70] sm:$0xff]  ;;  %v2424_v42 = vld [vmem:[#allocation10 + $0x138] sm:$0xff]   ;;  %v2436_v24 = vld [vmem:[#allocation11 + $0x8] sm:$0xff]  }
 0x1a3   : > { %2072 = vmatpush3.bf16.msra.mxu1 %v2400_v46  ;;  %2111 = vmatprep.subr.bf16.mxu0 %v2401_v47  ;;  %v591_v57 = vld [vmem:[#allocation2 + $0x50] sm:$0xff]  ;;  %v2426_v46 = vld [vmem:[#allocation10 + $0x1b8] sm:$0xff]   ;;  %v620_v47 = vpack.c.bf16 %v579_v15, %v3036_v59 }
 0x1a4   : > { %2073 = vmatprep.subr.bf16.mxu1 %v2402_v50  ;;  %v3044_v5 = vpack.c.bf16 %v591_v57, %v590_v39  ;;  %v3046_v7 = vld [vmem:[#allocation2 + $0x52] sm:$0xff]  ;;  %v3048_v13 = vld [vmem:[#allocation2 + $0x80] sm:$0xff] }
 0x1a5   : > { %v592_v58 = vld [vmem:[#allocation2 + $0x60] sm:$0xff]  ;;  %v3053_v19 = vpack.c.bf16 %v3046_v7, %v579_v15  ;;  %v598_v22 = vpack.c.bf16 %v3048_v13, %v593_v12  ;;  %v582_v33 = vld [vmem:[#allocation2 + $0x72] sm:$0xff]  ;;  %v635_v26 = vpack.c.bf16 %v2667_v37, %v3048_v13 }
 0x1a6   : > { %2112 = vmatpush3.bf16.msra.mxu0 %v2403_v51  ;;  %1278 = vmatmul.mubr.bf16.gmra.mrb[4].mxu1 %v3031_v53  ;;  %v597_v61 = vpack.c.bf16 %v592_v58, %v591_v57  ;;  %v562_v30 = vpack.c.bf16 %v593_v12, %v592_v58  ;;  %v581_v32 = vld [vmem:[#allocation2 + $0x62] sm:$0xff]  ;;  %v2423_v39 = vld [vmem:[#allocation10 + $0x1b0] sm:$0xff]  }
 0x1a7   : > { %2074 = vmatpush3.bf16.msra.mxu1 %v2404_v52  ;;  %1285 = vmatprep.mubr.bf16.mxu1 %v3017_v36  ;;  %v586_v41 = vpack.c.bf16 %v582_v33, %v581_v32  ;;  %v2429_v49 = vld [vmem:[#allocation10 + $0x210] sm:$0xff]   ;;  %v621_v50 = vpack.c.bf16 %v581_v32, %v3046_v7  ;;  %v618_v9 = vld [vmem:[#allocation2 + $0x82] sm:$0xff] }
 0x1a8   : > { %2113 = vmatprep.subr.bf16.mxu0 %v2405_v55  ;;  %2075 = vmatprep.subr.bf16.mxu1 %v2406_v56  ;;  %v643_v51 = vld [vmem:[#allocation2 + $0x91] sm:$0xff]  ;;  %v2440_v52 = vld [vmem:[#allocation11 + $0x28] sm:$0xff]   ;;  %v804_v56 = vstv %s1879_s14 }
 0x1a9   : > { %1343 = vmatmul.mubr.bf16.gmra.mrb[12].mxu0 %v3041_v62  ;;  %v647_v3 = vpack.c.bf16 %v643_v51, %v3007_v28  ;;  %v655_v31 = vld [vmem:[#allocation2 + $0x92] sm:$0xff] }
 0x1aa   : > { %2114 = vmatpush3.bf16.msra.mxu0 %v2407_v60  ;;  %1350 = vmatprep.mubr.bf16.mxu0 %v597_v61  ;;  %v2437_v37 = vld [vmem:[#allocation11 + $0x10] sm:$0xff]   ;;  %v2438_v28 = vld [vmem:[#allocation11 + $0x18] sm:$0xff]  }
 0x1ab   : > { %2076 = vmatpush3.bf16.msra.mxu1 %v2408_v63  ;;  %2115 = vmatprep.subr.bf16.mxu0 %v2409_v0 }
 0x1ac   : > { %2077 = vmatprep.subr.bf16.mxu1 %v2410_v1 }
 0x1ae   : > { %2116 = vmatpush3.bf16.msra.mxu0 %v2411_v2  ;;  %1286 = vmatmul.mubr.bf16.gmra.mrb[8].mxu1 %v3044_v5 }
 0x1af   : > { %2078 = vmatpush3.bf16.msra.mxu1 %v2412_v4  ;;  %1293 = vmatprep.mubr.bf16.mxu1 %v3025_v43 }
 0x1b0   : > { %2117 = vmatprep.subr.bf16.mxu0 %v2413_v10  ;;  %2079 = vmatprep.subr.bf16.mxu1 %v2414_v11 }
 0x1b1   : > { %1351 = vmatmul.mubr.bf16.gmra.mrb[16].mxu0 %v3053_v19 }
 0x1b2   : > { %1358 = vmatprep.mubr.bf16.mxu0 %v598_v22  ;;  %2118 = vmatpush3.bf16.msra.mxu0 %v2415_v16 }
 0x1b3   : > { %2080 = vmatpush3.bf16.msra.mxu1 %v2416_v20  ;;  %2119 = vmatprep.subr.bf16.mxu0 %v2417_v21 }
 0x1b4   : > { %2081 = vmatprep.subr.bf16.mxu1 %v2418_v23 }
 0x1b6   : > { %2120 = vmatpush3.bf16.msra.mxu0 %v2419_v25  ;;  %1294 = vmatmul.mubr.bf16.gmra.mrb[12].mxu1 %v562_v30 }
 0x1b7   : > { %2082 = vmatpush3.bf16.msra.mxu1 %v2420_v27  ;;  %1399 = vmatprep.mubr.bf16.mxu1 %v619_v38 }
 0x1b8   : > { %2121 = vmatprep.subr.bf16.mxu0 %v2421_v29  ;;  %2083 = vmatprep.subr.bf16.mxu1 %v2422_v35 }
 0x1b9   : > { %1359 = vmatmul.mubr.bf16.gmra.mrb[20].mxu0 %v586_v41 }
 0x1ba   : > { %2122 = vmatpush3.bf16.msra.mxu0 %v2423_v39  ;;  %1464 = vmatprep.mubr.bf16.mxu0 %v2998_v17  ;;  %v2430_v17 = vld [vmem:[#allocation10 + $0x218] sm:$0xff]  }
 0x1bb   : > { %2084 = vmatpush3.bf16.msra.mxu1 %v2424_v42  ;;  %2123 = vmatprep.subr.bf16.mxu0 %v2425_v44 }
 0x1bc   : > { %2197 = vmatprep.subr.bf16.mxu1 %v2427_v45 }
 0x1be   : > { %2124 = vmatpush3.bf16.msra.mxu0 %v2426_v46  ;;  %1400 = vmatmul.mubr.bf16.vlgmr.msra.gmra.mrb[16].mxu1 %v607_v18  ;;  %v2432_v18 = vld [vmem:[#allocation10 + $0x228] sm:$0xff]  }
 0x1bf   : > { %2198 = vmatpush3.bf16.msra.mxu1 %v2427_v45  ;;  %1407 = vmatprep.mubr.bf16.mxu1 %v620_v47 }
 0x1c0   : > { %2199 = vmatprep.subr.bf16.mxu1 %v2428_v34 }
 0x1c1   : > { %1465 = vmatmul.mubr.bf16.vlgmr.msra.gmra.mrb[24].mxu0 %v3031_v53  ;;  %v2441_v53 = vld [vmem:[#allocation11 + $0x30] sm:$0xff]  }
 0x1c2   : > { %1472 = vmatprep.mubr.bf16.mxu0 %v3017_v36  ;;  %v622_v36 = vpack.c.bf16 %v618_v9, %v582_v33 }
 0x1c3   : > { %2200 = vmatpush3.bf16.msra.mxu1 %v2428_v34 }
 0x1c4   : > { %2201 = vmatprep.subr.bf16.mxu1 %v2429_v49 }
 0x1c6   : > { %1408 = vmatmul.mubr.bf16.gmra.mrb[20].mxu1 %v608_v14  ;;  %v2434_v14 = vld [vmem:[#allocation10 + $0x238] sm:$0xff]  }
 0x1c7   : > { %2202 = vmatpush3.bf16.msra.mxu1 %v2429_v49  ;;  %1415 = vmatprep.mubr.bf16.mxu1 %v621_v50 }
 0x1c8   : > { %2203 = vmatprep.subr.bf16.mxu1 %v2430_v17 }
 0x1c9   : > { %1473 = vmatmul.mubr.bf16.gmra.mrb[28].mxu0 %v3044_v5 }
 0x1ca   : > { %1480 = vmatprep.mubr.bf16.mxu0 %v3025_v43  ;;  %v659_v43 = vpack.c.bf16 %v655_v31, %v618_v9 }
 0x1cb   : > { %2204 = vmatpush3.bf16.msra.mxu1 %v2430_v17 }
 0x1cc   : > { %2205 = vmatprep.subr.bf16.mxu1 %v2431_v6 }
 0x1ce   : > { %1416 = vmatmul.mubr.bf16.gmra.mrb[24].mxu1 %v609_v48  ;;  %v2435_v48 = vld [vmem:[#allocation11] sm:$0xff]  }
 0x1cf   : > { %2206 = vmatpush3.bf16.msra.mxu1 %v2431_v6  ;;  %1423 = vmatprep.mubr.bf16.mxu1 %v622_v36 }
 0x1d0   : > { %2207 = vmatprep.subr.bf16.mxu1 %v2432_v18  ;;  %2221 = vmatprep.subr.bf16.mxu0 %v2435_v48 }
 0x1d1   : > { %1481 = vmatmul.mubr.bf16.gmra.mrb[32].mxu0 %v562_v30 }
 0x1d2   : > { %1488 = vmatprep.mubr.bf16.mxu0 %v647_v3  ;;  %2222 = vmatpush3.bf16.msra.mxu0 %v2435_v48 }
 0x1d3   : > { %2208 = vmatpush3.bf16.msra.mxu1 %v2432_v18  ;;  %2223 = vmatprep.subr.bf16.mxu0 %v2436_v24 }
 0x1d4   : > { %2209 = vmatprep.subr.bf16.mxu1 %v2433_v8 }
 0x1d6   : > { %1424 = vmatmul.mubr.bf16.gmra.mrb[28].mxu1 %v610_v40  ;;  %2224 = vmatpush3.bf16.msra.mxu0 %v2436_v24  ;;  %v2439_v40 = vld [vmem:[#allocation11 + $0x20] sm:$0xff]  }
 0x1d7   : > { %2210 = vmatpush3.bf16.msra.mxu1 %v2433_v8  ;;  %2213 = vmatprep.mubr.bf16.mxu1 %v3041_v62 }
 0x1d8   : > { %2211 = vmatprep.subr.bf16.mxu1 %v2434_v14  ;;  %2225 = vmatprep.subr.bf16.mxu0 %v2437_v37 }
 0x1d9   : > { %1489 = vmatmul.mubr.bf16.gmra.mrb[36].mxu0 %v635_v26 }
 0x1da   : > { %2226 = vmatpush3.bf16.msra.mxu0 %v2437_v37 }
 0x1db   : > { %2212 = vmatpush3.bf16.msra.mxu1 %v2434_v14  ;;  %2227 = vmatprep.subr.bf16.mxu0 %v2438_v28 }
 0x1dc   : > { %2245 = vmatprep.subr.bf16.mxu1 %v2435_v48 }
 0x1de   : > { %2214 = vmatmul.mubr.bf16.vlgmr.msra.gmra.mrb[32].mxu1 %v3053_v19  ;;  %2228 = vmatpush3.bf16.msra.mxu0 %v2438_v28 }
 0x1df   : > { %2217 = vmatprep.mubr.bf16.mxu1 %v586_v41  ;;  %2253 = vmatpush3.bf16.msra.mxu1 %v2435_v48 }
 0x1e0   : > { %2246 = vmatprep.subr.bf16.mxu1 %v2436_v24  ;;  %2229 = vmatprep.subr.bf16.mxu0 %v2439_v40 }
 0x1e2   : > { %2230 = vmatpush3.bf16.msra.mxu0 %v2439_v40 }
 0x1e3   : > { %2254 = vmatpush3.bf16.msra.mxu1 %v2436_v24  ;;  %2231 = vmatprep.subr.bf16.mxu0 %v2440_v52 }
 0x1e4   : > { %2247 = vmatprep.subr.bf16.mxu1 %v2437_v37 }
 0x1e6   : > { %2218 = vmatmul.mubr.bf16.gmra.mrb[36].mxu1 %v659_v43  ;;  %2232 = vmatpush3.bf16.msra.mxu0 %v2440_v52 }
 0x1e7   : > { %2255 = vmatpush3.bf16.msra.mxu1 %v2437_v37  ;;  %2233 = vmatprep.subr.bf16.mxu0 %v2441_v53 }
 0x1e8   : > { %2248 = vmatprep.subr.bf16.mxu1 %v2438_v28 }
 0x1ea   : > { %2234 = vmatpush3.bf16.msra.mxu0 %v2441_v53 }
 0x1eb   : > { %2256 = vmatpush3.bf16.msra.mxu1 %v2438_v28  ;;  %2235 = vmatprep.subr.bf16.mxu0 %v2442_v54 }
 0x1ec   : > { %2249 = vmatprep.subr.bf16.mxu1 %v2439_v40 }
 0x1ee   : > { %2236 = vmatpush3.bf16.msra.mxu0 %v2442_v54 }
 0x1ef   : > { %2257 = vmatpush3.bf16.msra.mxu1 %v2439_v40 }
 0x1f0   : > { %2250 = vmatprep.subr.bf16.mxu1 %v2440_v52 }
 0x1f3   : > { %2258 = vmatpush3.bf16.msra.mxu1 %v2440_v52 }
 0x1f4   : > { %2251 = vmatprep.subr.bf16.mxu1 %v2441_v53 }
 0x1f7   : > { %2259 = vmatpush3.bf16.msra.mxu1 %v2441_v53 }
 0x1f8   : > { %2252 = vmatprep.subr.bf16.mxu1 %v2442_v54 }
 0x1fb   : > { %2260 = vmatpush3.bf16.msra.mxu1 %v2442_v54 }
 0x271   : > { %v2005_v55 = vpop.f32.mrb[0].mxu1 }
 0x272   : > { %v2006_v57 = vpop.f32.mrb[1].mxu1 }
 0x273   : > { %v2007_v58 = vadd.f32 %v2006_v57, %v2005_v55  ;;  %v2008_v59 = vpop.f32.mrb[2].mxu1 }
 0x274   : > { %v2045_v60 = vpop.f32.mrb[8].mxu0  ;;  %v2009_v61 = vpop.f32.mrb[3].mxu1 }
 0x275   : > { %v1272_v62 = vadd.f32 %v2007_v58, %v804_v56  ;;  %v2010_v63 = vadd.f32 %v2009_v61, %v2008_v59  ;;  %v2046_v0 = vpop.f32.mrb[9].mxu0 }
 0x276   : > { %v2047_v1 = vadd.f32 %v2046_v0, %v2045_v60  ;;  %v2048_v2 = vpop.f32.mrb[10].mxu0 }
 0x277   : > { %v1275_v4 = vadd.f32 %v2010_v63, %v804_v56  ;;  %v2049_v5 = vpop.f32.mrb[11].mxu0 }
 0x278   : > { %v1337_v7 = vadd.f32 %v2047_v1, %v1272_v62  ;;  %v2050_v10 = vadd.f32 %v2049_v5, %v2048_v2 }
 0x279   : > { %v2011_v11 = vpop.f32.mrb[4].mxu1 }
 0x27a   : > { %v1340_v12 = vadd.f32 %v2050_v10, %v1275_v4  ;;  %v2012_v13 = vpop.f32.mrb[5].mxu1 }
 0x27b   : > { %v2013_v15 = vadd.f32 %v2012_v13, %v2011_v11  ;;  %v2014_v16 = vpop.f32.mrb[6].mxu1 }
 0x27c   : > { %v2051_v19 = vpop.f32.mrb[12].mxu0  ;;  %v2015_v20 = vpop.f32.mrb[7].mxu1 }
 0x27d   : > { %v1280_v21 = vadd.f32 %v2013_v15, %v804_v56  ;;  %v2016_v22 = vadd.f32 %v2015_v20, %v2014_v16  ;;  %v2052_v23 = vpop.f32.mrb[13].mxu0 }
 0x27e   : > { %v2053_v25 = vadd.f32 %v2052_v23, %v2051_v19  ;;  %v2054_v27 = vpop.f32.mrb[14].mxu0 }
 0x27f   : > { %v1283_v29 = vadd.f32 %v2016_v22, %v804_v56  ;;  %v2055_v30 = vpop.f32.mrb[15].mxu0 }
 0x280   : > { %v1345_v32 = vadd.f32 %v2053_v25, %v1280_v21  ;;  %v2056_v33 = vadd.f32 %v2055_v30, %v2054_v27 }
 0x281   : > { %v2017_v35 = vpop.f32.mrb[8].mxu1 }
 0x282   : > { %v1348_v38 = vadd.f32 %v2056_v33, %v1283_v29  ;;  %v2018_v39 = vpop.f32.mrb[9].mxu1 }
 0x283   : > { %v2019_v41 = vadd.f32 %v2018_v39, %v2017_v35  ;;  %v2020_v42 = vpop.f32.mrb[10].mxu1 }
 0x284   : > { %v2057_v44 = vpop.f32.mrb[16].mxu0  ;;  %v2021_v45 = vpop.f32.mrb[11].mxu1 }
 0x285   : > { %v1288_v46 = vadd.f32 %v2019_v41, %v804_v56  ;;  %v2022_v34 = vadd.f32 %v2021_v45, %v2020_v42  ;;  %v2058_v47 = vpop.f32.mrb[17].mxu0 }
 0x286   : > { %v2059_v49 = vadd.f32 %v2058_v47, %v2057_v44  ;;  %v2060_v17 = vpop.f32.mrb[18].mxu0 }
 0x287   : > { %v1291_v50 = vadd.f32 %v2022_v34, %v804_v56  ;;  %v2061_v6 = vpop.f32.mrb[19].mxu0 }
 0x288   : > { %v1353_v9 = vadd.f32 %v2059_v49, %v1288_v46  ;;  %v2062_v18 = vadd.f32 %v2061_v6, %v2060_v17 }
 0x289   : > { %v2023_v36 = vpop.f32.mrb[12].mxu1 }
 0x28a   : > { %v1356_v51 = vadd.f32 %v2062_v18, %v1291_v50  ;;  %v2024_v3 = vpop.f32.mrb[13].mxu1 }
 0x28b   : > { %v2025_v8 = vadd.f32 %v2024_v3, %v2023_v36  ;;  %v2026_v14 = vpop.f32.mrb[14].mxu1 }
 0x28c   : > { %v2063_v26 = vpop.f32.mrb[20].mxu0  ;;  %v2027_v31 = vpop.f32.mrb[15].mxu1 }
 0x28d   : > { %v1296_v43 = vadd.f32 %v2025_v8, %v804_v56  ;;  %v2028_v48 = vadd.f32 %v2027_v31, %v2026_v14  ;;  %v2064_v24 = vpop.f32.mrb[21].mxu0 }
 0x28e   : > { %v2065_v37 = vadd.f32 %v2064_v24, %v2063_v26  ;;  %v2066_v28 = vpop.f32.mrb[22].mxu0 }
 0x28f   : > { %v1299_v40 = vadd.f32 %v2028_v48, %v804_v56  ;;  %v2067_v52 = vpop.f32.mrb[23].mxu0 }
 0x290   : > { %v1361_v53 = vadd.f32 %v2065_v37, %v1296_v43  ;;  %v2068_v54 = vadd.f32 %v2067_v52, %v2066_v28 }
 0x291   : > { %v2085_v55 = vpop.f32.mrb[16].mxu1 }
 0x292   : > { %v1364_v57 = vadd.f32 %v2068_v54, %v1299_v40  ;;  %v2086_v58 = vpop.f32.mrb[17].mxu1 }
 0x293   : > { %v2087_v59 = vadd.f32 %v2086_v58, %v2085_v55  ;;  %v2088_v60 = vpop.f32.mrb[18].mxu1 }
 0x294   : > { %v2125_v61 = vpop.f32.mrb[24].mxu0  ;;  %v2089_v62 = vpop.f32.mrb[19].mxu1 }
 0x295   : > { %v1402_v63 = vadd.f32 %v2087_v59, %v1337_v7  ;;  %v2090_v0 = vadd.f32 %v2089_v62, %v2088_v60  ;;  %v2126_v1 = vpop.f32.mrb[25].mxu0 }
 0x296   : > { %v2127_v2 = vadd.f32 %v2126_v1, %v2125_v61  ;;  %v2128_v4 = vpop.f32.mrb[26].mxu0 }
 0x297   : > { %v1405_v5 = vadd.f32 %v2090_v0, %v1340_v12  ;;  %v2129_v10 = vpop.f32.mrb[27].mxu0 }
 0x298   : > { %v2130_v11 = vadd.f32 %v2129_v10, %v2128_v4  ;;  %v1467_v13 = vadd.f32 %v2127_v2, %v1402_v63 }
 0x299   : > { %v2091_v56 = vpop.f32.mrb[20].mxu1 }
 0x29a   : > { %v2092_v15 = vpop.f32.mrb[21].mxu1  ;;  %v1470_v16 = vadd.f32 %v2130_v11, %v1405_v5 }
 0x29b   : > { %v2093_v19 = vadd.f32 %v2092_v15, %v2091_v56  ;;  %v2094_v20 = vpop.f32.mrb[22].mxu1 }
 0x29c   : > { %v2131_v21 = vpop.f32.mrb[28].mxu0  ;;  %v2095_v22 = vpop.f32.mrb[23].mxu1 }
 0x29d   : > { %v1410_v23 = vadd.f32 %v2093_v19, %v1345_v32  ;;  %v2096_v25 = vadd.f32 %v2095_v22, %v2094_v20  ;;  %v2132_v27 = vpop.f32.mrb[29].mxu0 }
 0x29e   : > { %v2133_v29 = vadd.f32 %v2132_v27, %v2131_v21  ;;  %v2134_v7 = vpop.f32.mrb[30].mxu0 }
 0x29f   : > { %v1413_v30 = vadd.f32 %v2096_v25, %v1348_v38  ;;  %v2135_v33 = vpop.f32.mrb[31].mxu0 }
 0x2a0   : > { %v2136_v35 = vadd.f32 %v2135_v33, %v2134_v7  ;;  %v1475_v39 = vadd.f32 %v2133_v29, %v1410_v23  ;;  %v1961_v33 = vld [vmem:[%s3163_s6] ss:$0 sm:$0xff] }
 0x2a1   : > { %v2097_v12 = vpop.f32.mrb[24].mxu1 }
 0x2a2   : > { %v2098_v41 = vpop.f32.mrb[25].mxu1  ;;  %v1478_v42 = vadd.f32 %v2136_v35, %v1413_v30 }
 0x2a3   : > { %v2099_v44 = vadd.f32 %v2098_v41, %v2097_v12  ;;  %v2100_v45 = vpop.f32.mrb[26].mxu1 }
 0x2a4   : > { %v2137_v46 = vpop.f32.mrb[32].mxu0  ;;  %v2101_v34 = vpop.f32.mrb[27].mxu1 }
 0x2a5   : > { %v1418_v47 = vadd.f32 %v2099_v44, %v1353_v9  ;;  %v2102_v49 = vadd.f32 %v2101_v34, %v2100_v45  ;;  %v2138_v17 = vpop.f32.mrb[33].mxu0  ;;  %v2443_v44 = vld [vmem:[%s2936_s18 + $0x10] sm:$0xff] }
 0x2a6   : > { %v2139_v50 = vadd.f32 %v2138_v17, %v2137_v46  ;;  %v2140_v32 = vpop.f32.mrb[34].mxu0 }
 0x2a7   : > { %v1421_v6 = vadd.f32 %v2102_v49, %v1356_v51  ;;  %v2141_v18 = vpop.f32.mrb[35].mxu0 }
 0x2a8   : > { %v2142_v36 = vadd.f32 %v2141_v18, %v2140_v32  ;;  %v1483_v3 = vadd.f32 %v2139_v50, %v1418_v47  ;;  %v2444_v47 = vld [vmem:[%s2936_s18] sm:$0xff]  ;;  %v2445_v32 = vld [vmem:[%s2936_s18 + $0x18] sm:$0xff] }
 0x2a9   : > { %v2103_v38 = vpop.f32.mrb[28].mxu1 }
 0x2aa   : > { %v2104_v8 = vpop.f32.mrb[29].mxu1  ;;  %v1486_v14 = vadd.f32 %v2142_v36, %v1421_v6  ;;  %v2446_v36 = vld [vmem:[%s2936_s18 + $0x8] sm:$0xff] }
 0x2ab   : > { %v2105_v26 = vadd.f32 %v2104_v8, %v2103_v38  ;;  %v2106_v31 = vpop.f32.mrb[30].mxu1 }
 0x2ac   : > { %v2143_v43 = vpop.f32.mrb[36].mxu0  ;;  %v2107_v48 = vpop.f32.mrb[31].mxu1 }
 0x2ad   : > { %v1426_v24 = vadd.f32 %v2105_v26, %v1361_v53  ;;  %v2108_v37 = vadd.f32 %v2107_v48, %v2106_v31  ;;  %v2144_v28 = vpop.f32.mrb[37].mxu0 }
 0x2ae   : > { %v2145_v40 = vadd.f32 %v2144_v28, %v2143_v43  ;;  %v2146_v9 = vpop.f32.mrb[38].mxu0 }
 0x2af   : > { %v1429_v52 = vadd.f32 %v2108_v37, %v1364_v57  ;;  %v2147_v54 = vpop.f32.mrb[39].mxu0 }
 0x2b0   : > { %v2148_v55 = vadd.f32 %v2147_v54, %v2146_v9  ;;  %v1491_v58 = vadd.f32 %v2145_v40, %v1426_v24  ;;  %v2447_v24 = vld [vmem:[%s2936_s18 + $0x30] sm:$0xff]  ;;  %v2448_v9 = vld [vmem:[%s2936_s18 + $0x20] sm:$0xff] }
 0x2b1   : > { %v2215_v51 = vpop.f32.mrb[32].mxu1 }
 0x2b2   : > { %v1540_v59 = vadd.f32 %v2215_v51, %v1475_v39  ;;  %v1531_v60 = vpop.f32.mrb[33].mxu1  ;;  %v1494_v61 = vadd.f32 %v2148_v55, %v1429_v52 }
 0x2b3   : > { %v1532_v62 = vadd.f32 %v1531_v60, %v1467_v13  ;;  %v2216_v63 = vpop.f32.mrb[34].mxu1  ;;  %v2450_v60 = vld [vmem:[%s2936_s18 + $0x28] sm:$0xff] }
 0x2b4   : > { %v1543_v0 = vadd.f32 %v2216_v63, %v1478_v42  ;;  %v1534_v1 = vpop.f32.mrb[35].mxu1  ;;  %v1564_v4 = vmax.f32 %v1540_v59, 0.0 }
 0x2b5   : > { %v1535_v2 = vadd.f32 %v1534_v1, %v1470_v16  ;;  %v1562_v53 = vmax.f32 %v1532_v62, 0.0 }
 0x2b6   : > { %v1565_v5 = vmax.f32 %v1543_v0, 0.0 }
 0x2b7   : > { %v1563_v10 = vmax.f32 %v1535_v2, 0.0 }
 0x2b8   : > { %v1571_v11 = vpack.c.bf16 %v1565_v5, %v1564_v4 }
 0x2b9   : > { %v1570_v56 = vpack.c.bf16 %v1563_v10, %v1562_v53  ;;  %v2219_v15 = vpop.f32.mrb[36].mxu1 }
 0x2ba   : > { %v1556_v57 = vadd.f32 %v2219_v15, %v1491_v58  ;;  %v1547_v19 = vpop.f32.mrb[37].mxu1  ;;  %v2449_v58 = vld [vmem:[%s2936_s18 + $0x38] sm:$0xff]  ;;  %s2668_s18 = smov [#allocation13]  }
 0x2bb   : > { %v1548_v20 = vadd.f32 %v1547_v19, %v1483_v3  ;;  %v2220_v21 = vpop.f32.mrb[38].mxu1  ;;  %2237 = vmatprep.mubr.bf16.mxu0 %v1570_v56  ;;  %s2582_s30 = sshll.u32 %s2668_s18, 4  ;;  %s2583_s30 = int_to_ptr.vmem [resolvable:$false] %s2582_s30 }
 0x2bc   : > { %v1559_v22 = vadd.f32 %v2220_v21, %v1494_v61  ;;  %v1550_v23 = vpop.f32.mrb[39].mxu1  ;;  %2238 = vmatmul.mubr.bf16.vlgmr.msra.gmra.mrb[40].mxu0 %v1571_v11  ;;  %v1568_v25 = vmax.f32 %v1556_v57, 0.0  ;;  %s2584_s9 = scalar_lea.vmem %s2583_s30, 2048  ;;  %p2585_p7 = scmp.lt.s32.totalorder %s3110_s12, %s2583_s30 }
 0x2bd   : > { %v1551_v13 = vadd.f32 %v1550_v23, %v1486_v14  ;;  %v1566_v16 = vmax.f32 %v1548_v20, 0.0  ;;  %p2586_p4 = scmp.lt.s32.totalorder %s2584_s9, %s2578_s10 }
 0x2be   : > { %v1569_v27 = vmax.f32 %v1559_v22, 0.0 }
 0x2bf   : > { %v1567_v29 = vmax.f32 %v1551_v13, 0.0  ;;  %p2587_p6 = por %p2586_p4, %p2585_p7 }
 0x2c0   : > { %v1573_v7 = vpack.c.bf16 %v1569_v27, %v1568_v25 }
 0x2c1   : > { %v1572_v30 = vpack.c.bf16 %v1567_v29, %v1566_v16  ;;  %p2588_p3 = pnand %p2587_p6, %p2581_p5 }
 0x2c3   : > { %2241 = vmatprep.mubr.bf16.mxu1 %v1572_v30 }
 0x2c4   : > { %2242 = vmatmul.mubr.bf16.vlgmr.msra.gmra.mrb[40].mxu1 %v1573_v7 }
 0x38f   : > { %v2239_v35 = vpop.f32.mrb[40].mxu0 }
 0x390   : > { %v1688_v39 = vadd.f32 %v2239_v35, %v1961_v33  ;;  %v1679_v12 = vpop.f32.mrb[41].mxu0 }
 0x391   : > { %v1680_v41 = vadd.f32 %v1961_v33, %v1679_v12  ;;  %v2240_v42 = vpop.f32.mrb[42].mxu0 }
 0x392   : > { %v1712_v45 = vadd.f32 %v2443_v44, %v1688_v39  ;;  %v1691_v46 = vadd.f32 %v2240_v42, %v1961_v33  ;;  %v1682_v34 = vpop.f32.mrb[43].mxu0 }
 0x393   : > { %v1710_v49 = vadd.f32 %v2444_v47, %v1680_v41  ;;  %v1683_v17 = vadd.f32 %v1961_v33, %v1682_v34 }
 0x394   : > { %v1720_v50 = vmax.f32 %v1712_v45, 0.0  ;;  %v1713_v6 = vadd.f32 %v2445_v32, %v1691_v46 }
 0x395   : > { %v1718_v18 = vmax.f32 %v1710_v49, 0.0  ;;  %v1711_v3 = vadd.f32 %v2446_v36, %v1683_v17 }
 0x396   : > { %1728 = vst [vmem:[%s3092_s15 + $0x10] sm:$0xff] %v1720_v50  ;;  %v1721_v38 = vmax.f32 %v1713_v6, 0.0 }
 0x397   : > { %1726 = vst [vmem:[%s3092_s15] sm:$0xff] %v1718_v18  ;;  %v1719_v8 = vmax.f32 %v1711_v3, 0.0  ;;  %v2243_v14 = vpop.f32.mrb[40].mxu1 }
 0x398   : > { %1729 = vst [vmem:[%s3092_s15 + $0x18] sm:$0xff] %v1721_v38  ;;  %v1704_v26 = vadd.f32 %v2243_v14, %v1961_v33  ;;  %v1695_v31 = vpop.f32.mrb[41].mxu1 }
 0x399   : > { %1727 = vst [vmem:[%s3092_s15 + $0x8] sm:$0xff] %v1719_v8  ;;  %v1696_v43 = vadd.f32 %v1961_v33, %v1695_v31  ;;  %v2244_v48 = vpop.f32.mrb[42].mxu1 }
 0x39a   : > { %v1716_v37 = vadd.f32 %v2447_v24, %v1704_v26  ;;  %v1707_v28 = vadd.f32 %v2244_v48, %v1961_v33  ;;  %v1698_v40 = vpop.f32.mrb[43].mxu1 }
 0x39b   : > { %v1714_v52 = vadd.f32 %v2448_v9, %v1696_v43  ;;  %v1699_v54 = vadd.f32 %v1961_v33, %v1698_v40 }
 0x39c   : > { %v1724_v55 = vmax.f32 %v1716_v37, 0.0  ;;  %v1717_v51 = vadd.f32 %v2449_v58, %v1707_v28 }
 0x39d   : > { %v1722_v59 = vmax.f32 %v1714_v52, 0.0  ;;  %v1715_v61 = vadd.f32 %v2450_v60, %v1699_v54 }
 0x39e   : > { %1732 = vst [vmem:[%s3092_s15 + $0x30] sm:$0xff] %v1724_v55  ;;  %v1725_v62 = vmax.f32 %v1717_v51, 0.0 }
 0x39f   : > { %1730 = vst [vmem:[%s3092_s15 + $0x20] sm:$0xff] %v1722_v59  ;;  %v1723_v63 = vmax.f32 %v1715_v61, 0.0 }
 0x3a0   : > { %1733 = vst [vmem:[%s3092_s15 + $0x38] sm:$0xff] %v1725_v62 }
 0x3a1   : > { %1731 = vst [vmem:[%s3092_s15 + $0x28] sm:$0xff] %v1723_v63 }
 0x3a2   : > { %2591 = shalt.err (!%p2588_p3)
}
 0x3a3   : > { %s2592_s8 = scalar_lea.hbm %s3108_s29, 1024  ;;  %s2596_s19 = scalar_lea.hbm %s3164_s7, 2048 }
 0x3a4   : > { %p2593_p8 = scmp.ne.s32.totalorder %s3108_s29, %s2592_s8  ;;  %p2597_p9 = scmp.lt.u32.totalorder %s3108_s29, %s3164_s7 }
 0x3a5   : > { %p2598_p0 = scmp.lt.u32.totalorder %s2596_s19, %s2592_s8  ;;  %p2600_p2 = scmp.lt.u32.totalorder %s2592_s8, %s3108_s29 }
 0x3a6   : > { %p2594_p11 = pnand %p2593_p8, %p2874_p12 }
 0x3a7   : > { %p2599_p1 = por %p2598_p0, %p2597_p9 }
 0x3a8   : > { %p2595_p13 = pneg %p2594_p11 }
 0x3a9   : > { %p2601_p10 = por %p2600_p2, %p2599_p1 }
 0x3ab   : > { %p2602_p5 = pnand %p2601_p10, %p2595_p13 }
 0x3ad   : > { %2605 = shalt.err (!%p2602_p5)
}
 0x3ae   : > { %s2669_s11 = smov 128   ;;  %s2670_s13 = smov 8  }
 0x3af   : > { %2279 = dma.vmem_to_hbm [thread:$0]  (%p2874_p12), %s3110_s12, 1024, %s3108_s29, %s1735_s28, %s2669_s11, %s2669_s11, %s2670_s13  }
 0x3b0 PF: > { %s3186_s10 = sld [smem:[#allocation19_spill]]  ;;  %s1763_s18 = sand.u32 1, %s2644_s24  }
 0x3b1   : > { %p3188_p4 = scmp.ge.s32.totalorder %s2656_s27, 2  ;;  %s1764_s30 = scalar_lea.sflag [#allocation5], %s1763_s18 }
 0x3b6   : > { %p3187_p7 = scmp.ne.s32.totalorder %s3186_s10, 0 }
 0x3b8   : > { %p2299_p6 = pnand %p3188_p4, %p3187_p7 }
 0x3ba   : > { %2639 = dma.done.wait (!%p2299_p6), %s1764_s30, 1024  }
 0x3bb   : > { %2641 = vsyncadd (!%p2299_p6), %s1764_s30, 4294966272  ;;  %p23_p3 = scmp.ge.s32.totalorder %s2864_s20, 4   ;;  %s3189_s24 = smov %s2648_s25 }
 0x3bc   : > { %s3190_s25 = smov %s2652_s26  ;;  %s3191_s26 = smov %s2880_s17 }
 0x3bd   : > { %s3192_s27 = smov %s2864_s20  ;;  %25 = sbr.rel (!%p23_p3) target bundleno = 8 (0x8), region = 113 }
 0x3c4   :  { %1769 = vsyncpa [#allocation4], 1 }
 0x3c5   :  { %1771 = vsyncpa [#allocation4 + $0x1], 1 }
 0x3c6   :  { %1772 = vsyncpa [#allocation9], 1 }
 0x3c7   :  { %1773 = vsyncpa [#allocation12], 1 }
 0x3c8   :  { %1774 = vsyncpa [#allocation5], 1 }
 0x3c9   :  { %1776 = vsyncpa [#allocation5 + $0x1], 1 }
 0x3ca   :  { %1777 = vsyncpa [#allocation6], 1 }
 0x3cb   :  { %1779 = vsyncpa [#allocation6 + $0x1], 1 }

</bundles_post_ra>
